<compile_context>
chip_gen: v7x
topology: tpu7x:2x2x1
jax: 0.10.0
libtpu: 0.0.40
codegen_flags: <defaults>
</compile_context>

<pallas_src>
import math
import numpy as np

import jax
import jax.numpy as jnp
from jax.experimental import pallas as pl
from jax.experimental.pallas import tpu as pltpu


# --------------------------- fused GRU + FC kernel ----------------------------

def make_fused_gru_fc_kernel(T, Bp, B, H, num_layers):
    """Kernel factory; shapes are baked in and the time/layer loops are static.

    Packed-gate layout (width Wp = 4*H, a multiple of 128):
      lanes [0:H)   = r gate
      lanes [H:2H)  = z gate
      lanes [2H:3H) = n gate            (hidden state h also lives here)
      lanes [3H:4H) = z gate duplicate  (makes the z->n roll direction-agnostic)
    """
    L = num_layers
    Wp = 4 * H

    def kernel(*refs):
        # refs = [x, (w_ih, w_hh, b_i, b_h) * L, w_fc, b_fc, out, gi0_scratch]
        x_ref = refs[0]
        lrefs = refs[1:1 + 4 * L]
        w_fc_ref = refs[1 + 4 * L]
        b_fc_ref = refs[2 + 4 * L]
        o_ref = refs[3 + 4 * L]
        gi0_ref = refs[4 + 4 * L]          # VMEM scratch (T*Bp, Wp) f32

        w_ih = [lrefs[4 * l + 0] for l in range(L)]
        w_hh = [lrefs[4 * l + 1] for l in range(L)]
        b_i = [lrefs[4 * l + 2] for l in range(L)]
        b_h = [lrefs[4 * l + 3] for l in range(L)]

        # Hoisted, non-recurrent layer-0 input projection: one batched MXU
        # matmul over all timesteps (bf16 operands, f32 accumulation).
        gi0_ref[...] = (
            jnp.dot(x_ref[...], w_ih[0][...], preferred_element_type=jnp.float32)
            + b_i[0][...])

        # Hidden state: (Bp, Wp) f32, active columns = n-gate lanes [2H:3H).
        # Other lanes carry bounded junk that only ever multiplies zero weight
        # rows, so it never leaks into the math.
        h = [jnp.zeros((Bp, Wp), jnp.float32) for _ in range(L)]

        # Static (fully unrolled) time loop with all layers fused inside.
        # (For T >> 32, switch to lax.fori_loop with small unroll.)
        for t in range(T):
            for l in range(L):
                if l == 0:
                    gi = gi0_ref[t * Bp:(t + 1) * Bp, :]    # vreg-aligned slab
                else:
                    gi = (jnp.dot(h[l - 1].astype(jnp.bfloat16), w_ih[l][...],
                                  preferred_element_type=jnp.float32)
                          + b_i[l][...])
                # ghb = W_h h + b_hh_n (n lanes only; r/z hidden biases are
                # folded into b_i at prep time).  Single (Bp,Wp)@(Wp,Wp) pass.
                ghb = (jnp.dot(h[l].astype(jnp.bfloat16), w_hh[l][...],
                               preferred_element_type=jnp.float32)
                       + b_h[l][...])
                # r | z | . | z  on one vreg row (f32 VPU/EUP work on 1 vreg).
                sig = jax.nn.sigmoid(gi + ghb)
                # Align r with the n-gate lanes (shift 2H == Wp/2: direction-free).
                r_n = pltpu.roll(sig, 2 * H, 1)
                n = jnp.tanh(gi + r_n * ghb)                # n on n lanes
                # Align z with the n-gate lanes; the duplicated z block makes
                # this correct for either rotate direction.
                z_n = pltpu.roll(sig, H, 1)
                h[l] = n + z_n * (h[l] - n)                 # (1-z)*n + z*h

        # Final Linear on the last timestep of the last layer; single HBM store.
        out = (jnp.dot(h[L - 1].astype(jnp.bfloat16), w_fc_ref[...],
                       preferred_element_type=jnp.float32) + b_fc_ref[...])
        o_ref[...] = out[:B, :].astype(o_ref.dtype)

    return kernel


def fused_gru_fc(x_tm, flat_params, *, T, Bp, B, H, num_layers, out_dim):
    kernel = make_fused_gru_fc_kernel(T, Bp, B, H, num_layers)
    inputs = (x_tm,) + tuple(flat_params)
    # No grid: every array is one full VMEM-resident block.
    in_specs = [pl.BlockSpec(tuple(a.shape), lambda: (0, 0)) for a in inputs]
    return pl.pallas_call(
        kernel,
        out_shape=jax.ShapeDtypeStruct((B, out_dim), jnp.float32),
        in_specs=in_specs,
        out_specs=pl.BlockSpec((B, out_dim), lambda: (0, 0)),
        scratch_shapes=[pltpu.VMEM((T * Bp, 4 * H), jnp.float32)],
        # Explicit VMEM budget (v7x guard: 64 MiB physical / 32 MiB scoped
        # default).  At these sizes resident data is < 1 MiB; introduce K/N
        # tiling of w_ih/w_hh via a grid once weights approach ~48 MiB.
        compiler_params=pltpu.CompilerParams(vmem_limit_bytes=32 * 1024 * 1024),
    )(*inputs)


# ----------------------------- parameter handling ------------------------------

def init_torch_style_params(key, input_dim, hidden_dim, num_layers, output_dim):
    """PyTorch nn.GRU / nn.Linear layout, uniform(-1/sqrt(H), 1/sqrt(H))."""
    k = 1.0 / math.sqrt(hidden_dim)
    layers = []
    for layer in range(num_layers):
        d_in = input_dim if layer == 0 else hidden_dim
        key, k1, k2, k3, k4 = jax.random.split(key, 5)
        w_ih = jax.random.uniform(k1, (3 * hidden_dim, d_in), jnp.float32, -k, k)
        w_hh = jax.random.uniform(k2, (3 * hidden_dim, hidden_dim), jnp.float32, -k, k)
        b_ih = jax.random.uniform(k3, (3 * hidden_dim,), jnp.float32, -k, k)
        b_hh = jax.random.uniform(k4, (3 * hidden_dim,), jnp.float32, -k, k)
        layers.append((w_ih, w_hh, b_ih, b_hh))
    key, k5, k6 = jax.random.split(key, 3)
    w_fc = jax.random.uniform(k5, (output_dim, hidden_dim), jnp.float32, -k, k)
    b_fc = jax.random.uniform(k6, (output_dim,), jnp.float32, -k, k)
    return layers, w_fc, b_fc


def prepare_kernel_params(layers, w_fc, b_fc, input_dim, hidden_dim):
    """Repack PyTorch-layout params into the kernel layout:

    * transposed bf16 weights with the three gates packed into Wp = 4*H
      contiguous lanes: [r | z | n | z-duplicate],
    * r/z hidden biases folded into the input bias; only b_hh_n stays hidden-side,
    * hidden-state rows (for w_hh, deeper w_ih and w_fc) placed at the n-gate
      lane block [2H:3H) to match where h lives inside the kernel.
    """
    H = hidden_dim
    assert H % 32 == 0, "packed-gate layout needs 4*H to be a 128-lane multiple"
    Wp = 4 * H
    flat = []
    for l, (w_ih, w_hh, b_ih, b_hh) in enumerate(layers):
        d_in = input_dim if l == 0 else H
        rows = d_in if l == 0 else Wp        # deeper layers consume the packed h
        row_off = 0 if l == 0 else 2 * H     # h's active lanes are [2H:3H)
        w_ih_t = w_ih.T                      # (d_in, 3H), gate order r|z|n
        w_hh_t = w_hh.T                      # (H, 3H)
        w_ih_p = jnp.zeros((rows, Wp), jnp.float32)
        w_hh_p = jnp.zeros((Wp, Wp), jnp.float32)
        b_i = jnp.zeros((1, Wp), jnp.float32)
        b_h = jnp.zeros((1, Wp), jnp.float32)
        # Column blocks: dst lane offset <- src gate offset (z duplicated at 3H).
        for dst, src in ((0, 0), (H, H), (2 * H, 2 * H), (3 * H, H)):
            w_ih_p = w_ih_p.at[row_off:row_off + d_in, dst:dst + H].set(
                w_ih_t[:, src:src + H])
            w_hh_p = w_hh_p.at[2 * H:3 * H, dst:dst + H].set(
                w_hh_t[:, src:src + H])
        # r/z: b_ih + b_hh folded together (also in the z duplicate block);
        # n: b_ih only on the input side, b_hh_n stays on the hidden side
        # because the n gate multiplies it by r.
        b_i = b_i.at[0, 0:H].set(b_ih[0:H] + b_hh[0:H])
        b_i = b_i.at[0, H:2 * H].set(b_ih[H:2 * H] + b_hh[H:2 * H])
        b_i = b_i.at[0, 2 * H:3 * H].set(b_ih[2 * H:3 * H])
        b_i = b_i.at[0, 3 * H:4 * H].set(b_ih[H:2 * H] + b_hh[H:2 * H])
        b_h = b_h.at[0, 2 * H:3 * H].set(b_hh[2 * H:3 * H])
        flat.extend([w_ih_p.astype(jnp.bfloat16), w_hh_p.astype(jnp.bfloat16),
                     b_i, b_h])
    out_dim = w_fc.shape[0]
    w_fc_p = jnp.zeros((Wp, out_dim), jnp.float32).at[2 * H:3 * H, :].set(w_fc.T)
    flat.extend([w_fc_p.astype(jnp.bfloat16), b_fc.reshape(1, out_dim)])
    return tuple(flat)


# ----------------------------- full model wrapper ------------------------------

@jax.jit
def gru_model_forward(x_btd, flat_params):
    """x_btd: (B, T, input_dim), batch_first like the PyTorch module."""
    B, T, D = x_btd.shape
    num_layers = (len(flat_params) - 2) // 4
    Wp = flat_params[1].shape[0]            # w_hh0: (Wp, Wp), Wp = 4*H
    H = Wp // 4
    out_dim = flat_params[-2].shape[1]      # w_fc:  (Wp, out_dim)
    Bp = ((B + 7) // 8) * 8                 # pad batch to a sublane multiple

    x = x_btd.astype(jnp.float32)
    if Bp != B:
        x = jnp.concatenate([x, jnp.zeros((Bp - B, T, D), jnp.float32)], axis=0)
    # batch-first -> time-major, flattened so timestep t is the contiguous,
    # sublane-aligned row block [t*Bp : (t+1)*Bp]; bf16 for the MXU operand.
    x_tm = jnp.transpose(x, (1, 0, 2)).reshape(T * Bp, D).astype(jnp.bfloat16)
    return fused_gru_fc(x_tm, flat_params, T=T, Bp=Bp, B=B, H=H,
                        num_layers=num_layers, out_dim=out_dim)


# ------------------------------- pure-JAX reference ----------------------------

def gru_reference(x_btd, layers, w_fc, b_fc):
    """Mirror of the PyTorch module (inference; dropout is a no-op)."""
    hp = jax.lax.Precision.HIGHEST
    B, T, _ = x_btd.shape
    H = layers[0][1].shape[1]
    h = [jnp.zeros((B, H), jnp.float32) for _ in layers]
    for t in range(T):
        inp = x_btd[:, t, :]
        for l, (w_ih, w_hh, b_ih, b_hh) in enumerate(layers):
            gi = jnp.dot(inp, w_ih.T, precision=hp) + b_ih
            gh = jnp.dot(h[l], w_hh.T, precision=hp) + b_hh
            i_r, i_z, i_n = jnp.split(gi, 3, axis=1)
            h_r, h_z, h_n = jnp.split(gh, 3, axis=1)
            r = jax.nn.sigmoid(i_r + h_r)
            z = jax.nn.sigmoid(i_z + h_z)
            n = jnp.tanh(i_n + r * h_n)
            h[l] = (1.0 - z) * n + z * h[l]
            inp = h[l]
    return jnp.dot(h[-1], w_fc.T, precision=hp) + b_fc


# ----------------------------------- main --------------------------------------

if __name__ == "__main__":
    input_dim, hidden_dim, num_layers, output_dim = 8, 32, 2, 1
    batch, seq = 4, 8

    key = jax.random.PRNGKey(0)
    key, kx, kp = jax.random.split(key, 3)

    x = jax.random.normal(kx, (batch, seq, input_dim), jnp.float32)
    layers, w_fc, b_fc = init_torch_style_params(
        kp, input_dim, hidden_dim, num_layers, output_dim)
    flat_params = prepare_kernel_params(layers, w_fc, b_fc, input_dim, hidden_dim)

    out = gru_model_forward(x, flat_params)
    out = jax.block_until_ready(out)
    assert out.shape == (batch, output_dim), out.shape

    ref = gru_reference(x, layers, w_fc, b_fc)
    # bf16 matmul operands with f32 accumulation vs. the f32 HIGHEST reference.
    np.testing.assert_allclose(np.asarray(out), np.asarray(ref),
                               rtol=2e-2, atol=2e-2)
    print("KERNEL_OK")
</pallas_src>

<mosaic_0001>
module attributes {stable_mosaic.version = 11 : i64} {
  func.func @kernel(%arg0: memref<64x8xbf16, #tpu.memory_space<vmem>>, %arg1: memref<8x128xbf16, #tpu.memory_space<vmem>>, %arg2: memref<128x128xbf16, #tpu.memory_space<vmem>>, %arg3: memref<1x128xf32, #tpu.memory_space<vmem>>, %arg4: memref<1x128xf32, #tpu.memory_space<vmem>>, %arg5: memref<128x128xbf16, #tpu.memory_space<vmem>>, %arg6: memref<128x128xbf16, #tpu.memory_space<vmem>>, %arg7: memref<1x128xf32, #tpu.memory_space<vmem>>, %arg8: memref<1x128xf32, #tpu.memory_space<vmem>>, %arg9: memref<128x1xbf16, #tpu.memory_space<vmem>>, %arg10: memref<1x1xf32, #tpu.memory_space<vmem>>, %arg11: memref<4x1xf32, #tpu.memory_space<vmem>>, %arg12: memref<64x128xf32, #tpu.memory_space<vmem>>) attributes {dimension_semantics = [], scalar_prefetch = 0 : i64, scratch_operands = 1 : i64, tpu.core_type = #tpu.core_type<tc>} {
    %c0 = arith.constant 0 : index
    %c0_0 = arith.constant 0 : index
    %0 = vector.load %arg0[%c0, %c0_0] : memref<64x8xbf16, #tpu.memory_space<vmem>>, vector<64x8xbf16>
    %c0_1 = arith.constant 0 : index
    %c0_2 = arith.constant 0 : index
    %1 = vector.load %arg1[%c0_1, %c0_2] : memref<8x128xbf16, #tpu.memory_space<vmem>>, vector<8x128xbf16>
    %cst = arith.constant dense<0.000000e+00> : vector<64x128xf32>
    %2 = tpu.matmul %0, %1, %cst {dimension_numbers = #tpu.dot_dimension_numbers<[1], [0], [0], [1], [0, 0, 1, 1], [], []>} : vector<64x8xbf16>, vector<8x128xbf16>, vector<64x128xf32> -> vector<64x128xf32>
    %c0_3 = arith.constant 0 : index
    %c0_4 = arith.constant 0 : index
    %3 = vector.load %arg3[%c0_3, %c0_4] : memref<1x128xf32, #tpu.memory_space<vmem>>, vector<1x128xf32>
    %4 = vector.broadcast %3 : vector<1x128xf32> to vector<64x128xf32>
    %5 = arith.addf %2, %4 : vector<64x128xf32>
    %c0_5 = arith.constant 0 : index
    %c0_6 = arith.constant 0 : index
    %6 = vector.load %arg12[%c0_5, %c0_6] : memref<64x128xf32, #tpu.memory_space<vmem>>, vector<64x128xf32>
    tpu.vector_store %arg12[%c0_5, %c0_6], %5 {strides = array<i32>} : memref<64x128xf32, #tpu.memory_space<vmem>>, vector<64x128xf32>,
    %cst_7 = arith.constant 0.000000e+00 : f32
    %7 = vector.broadcast %cst_7 : f32 to vector<8x128xf32>
    %cst_8 = arith.constant 0.000000e+00 : f32
    %8 = vector.broadcast %cst_8 : f32 to vector<8x128xf32>
    %c0_9 = arith.constant 0 : index
    %c0_10 = arith.constant 0 : index
    %9 = vector.load %arg12[%c0_9, %c0_10] : memref<64x128xf32, #tpu.memory_space<vmem>>, vector<8x128xf32>
    %10 = arith.truncf %7 : vector<8x128xf32> to vector<8x128xbf16>
    %c0_11 = arith.constant 0 : index
    %c0_12 = arith.constant 0 : index
    %11 = vector.load %arg2[%c0_11, %c0_12] : memref<128x128xbf16, #tpu.memory_space<vmem>>, vector<128x128xbf16>
    %cst_13 = arith.constant dense<0.000000e+00> : vector<8x128xf32>
    %12 = tpu.matmul %10, %11, %cst_13 {dimension_numbers = #tpu.dot_dimension_numbers<[1], [0], [0], [1], [0, 0, 1, 1], [], []>} : vector<8x128xbf16>, vector<128x128xbf16>, vector<8x128xf32> -> vector<8x128xf32>
    %c0_14 = arith.constant 0 : index
    %c0_15 = arith.constant 0 : index
    %13 = vector.load %arg4[%c0_14, %c0_15] : memref<1x128xf32, #tpu.memory_space<vmem>>, vector<1x128xf32>
    %14 = vector.broadcast %13 : vector<1x128xf32> to vector<8x128xf32>
    %15 = arith.addf %12, %14 : vector<8x128xf32>
    %16 = arith.addf %9, %15 : vector<8x128xf32>
    %17 = arith.negf %16 : vector<8x128xf32>
    %18 = math.exp %17 : vector<8x128xf32>
    %cst_16 = arith.constant 1.000000e+00 : f32
    %19 = vector.broadcast %cst_16 : f32 to vector<8x128xf32>
    %20 = arith.addf %19, %18 : vector<8x128xf32>
    %21 = arith.divf %19, %20 : vector<8x128xf32>
    %c64_i32 = arith.constant 64 : i32
    %22 = tpu.dynamic_rotate %21 by %c64_i32 dim 1 : vector<8x128xf32>, i32 -> vector<8x128xf32>
    %23 = arith.mulf %22, %15 : vector<8x128xf32>
    %24 = arith.addf %9, %23 : vector<8x128xf32>
    %25 = math.tanh %24 : vector<8x128xf32>
    %c32_i32 = arith.constant 32 : i32
    %26 = tpu.dynamic_rotate %21 by %c32_i32 dim 1 : vector<8x128xf32>, i32 -> vector<8x128xf32>
    %27 = arith.subf %7, %25 : vector<8x128xf32>
    %28 = arith.mulf %26, %27 : vector<8x128xf32>
    %29 = arith.addf %25, %28 : vector<8x128xf32>
    %30 = arith.truncf %29 : vector<8x128xf32> to vector<8x128xbf16>
    %c0_17 = arith.constant 0 : index
    %c0_18 = arith.constant 0 : index
    %31 = vector.load %arg5[%c0_17, %c0_18] : memref<128x128xbf16, #tpu.memory_space<vmem>>, vector<128x128xbf16>
    %cst_19 = arith.constant dense<0.000000e+00> : vector<8x128xf32>
    %32 = tpu.matmul %30, %31, %cst_19 {dimension_numbers = #tpu.dot_dimension_numbers<[1], [0], [0], [1], [0, 0, 1, 1], [], []>} : vector<8x128xbf16>, vector<128x128xbf16>, vector<8x128xf32> -> vector<8x128xf32>
    %c0_20 = arith.constant 0 : index
    %c0_21 = arith.constant 0 : index
    %33 = vector.load %arg7[%c0_20, %c0_21] : memref<1x128xf32, #tpu.memory_space<vmem>>, vector<1x128xf32>
    %34 = vector.broadcast %33 : vector<1x128xf32> to vector<8x128xf32>
    %35 = arith.addf %32, %34 : vector<8x128xf32>
    %36 = arith.truncf %8 : vector<8x128xf32> to vector<8x128xbf16>
    %c0_22 = arith.constant 0 : index
    %c0_23 = arith.constant 0 : index
    %37 = vector.load %arg6[%c0_22, %c0_23] : memref<128x128xbf16, #tpu.memory_space<vmem>>, vector<128x128xbf16>
    %cst_24 = arith.constant dense<0.000000e+00> : vector<8x128xf32>
    %38 = tpu.matmul %36, %37, %cst_24 {dimension_numbers = #tpu.dot_dimension_numbers<[1], [0], [0], [1], [0, 0, 1, 1], [], []>} : vector<8x128xbf16>, vector<128x128xbf16>, vector<8x128xf32> -> vector<8x128xf32>
    %c0_25 = arith.constant 0 : index
    %c0_26 = arith.constant 0 : index
    %39 = vector.load %arg8[%c0_25, %c0_26] : memref<1x128xf32, #tpu.memory_space<vmem>>, vector<1x128xf32>
    %40 = vector.broadcast %39 : vector<1x128xf32> to vector<8x128xf32>
    %41 = arith.addf %38, %40 : vector<8x128xf32>
    %42 = arith.addf %35, %41 : vector<8x128xf32>
    %43 = arith.negf %42 : vector<8x128xf32>
    %44 = math.exp %43 : vector<8x128xf32>
    %cst_27 = arith.constant 1.000000e+00 : f32
    %45 = vector.broadcast %cst_27 : f32 to vector<8x128xf32>
    %46 = arith.addf %45, %44 : vector<8x128xf32>
    %47 = arith.divf %45, %46 : vector<8x128xf32>
    %c64_i32_28 = arith.constant 64 : i32
    %48 = tpu.dynamic_rotate %47 by %c64_i32_28 dim 1 : vector<8x128xf32>, i32 -> vector<8x128xf32>
    %49 = arith.mulf %48, %41 : vector<8x128xf32>
    %50 = arith.addf %35, %49 : vector<8x128xf32>
    %51 = math.tanh %50 : vector<8x128xf32>
    %c32_i32_29 = arith.constant 32 : i32
    %52 = tpu.dynamic_rotate %47 by %c32_i32_29 dim 1 : vector<8x128xf32>, i32 -> vector<8x128xf32>
    %53 = arith.subf %8, %51 : vector<8x128xf32>
    %54 = arith.mulf %52, %53 : vector<8x128xf32>
    %55 = arith.addf %51, %54 : vector<8x128xf32>
    %c8 = arith.constant 8 : index
    %c0_30 = arith.constant 0 : index
    %56 = vector.load %arg12[%c8, %c0_30] : memref<64x128xf32, #tpu.memory_space<vmem>>, vector<8x128xf32>
    %57 = arith.truncf %29 : vector<8x128xf32> to vector<8x128xbf16>
    %c0_31 = arith.constant 0 : index
    %c0_32 = arith.constant 0 : index
    %58 = vector.load %arg2[%c0_31, %c0_32] : memref<128x128xbf16, #tpu.memory_space<vmem>>, vector<128x128xbf16>
    %cst_33 = arith.constant dense<0.000000e+00> : vector<8x128xf32>
    %59 = tpu.matmul %57, %58, %cst_33 {dimension_numbers = #tpu.dot_dimension_numbers<[1], [0], [0], [1], [0, 0, 1, 1], [], []>} : vector<8x128xbf16>, vector<128x128xbf16>, vector<8x128xf32> -> vector<8x128xf32>
    %c0_34 = arith.constant 0 : index
    %c0_35 = arith.constant 0 : index
    %60 = vector.load %arg4[%c0_34, %c0_35] : memref<1x128xf32, #tpu.memory_space<vmem>>, vector<1x128xf32>
    %61 = vector.broadcast %60 : vector<1x128xf32> to vector<8x128xf32>
    %62 = arith.addf %59, %61 : vector<8x128xf32>
    %63 = arith.addf %56, %62 : vector<8x128xf32>
    %64 = arith.negf %63 : vector<8x128xf32>
    %65 = math.exp %64 : vector<8x128xf32>
    %cst_36 = arith.constant 1.000000e+00 : f32
    %66 = vector.broadcast %cst_36 : f32 to vector<8x128xf32>
    %67 = arith.addf %66, %65 : vector<8x128xf32>
    %68 = arith.divf %66, %67 : vector<8x128xf32>
    %c64_i32_37 = arith.constant 64 : i32
    %69 = tpu.dynamic_rotate %68 by %c64_i32_37 dim 1 : vector<8x128xf32>, i32 -> vector<8x128xf32>
    %70 = arith.mulf %69, %62 : vector<8x128xf32>
    %71 = arith.addf %56, %70 : vector<8x128xf32>
    %72 = math.tanh %71 : vector<8x128xf32>
    %c32_i32_38 = arith.constant 32 : i32
    %73 = tpu.dynamic_rotate %68 by %c32_i32_38 dim 1 : vector<8x128xf32>, i32 -> vector<8x128xf32>
    %74 = arith.subf %29, %72 : vector<8x128xf32>
    %75 = arith.mulf %73, %74 : vector<8x128xf32>
    %76 = arith.addf %72, %75 : vector<8x128xf32>
    %77 = arith.truncf %76 : vector<8x128xf32> to vector<8x128xbf16>
    %c0_39 = arith.constant 0 : index
    %c0_40 = arith.constant 0 : index
    %78 = vector.load %arg5[%c0_39, %c0_40] : memref<128x128xbf16, #tpu.memory_space<vmem>>, vector<128x128xbf16>
    %cst_41 = arith.constant dense<0.000000e+00> : vector<8x128xf32>
    %79 = tpu.matmul %77, %78, %cst_41 {dimension_numbers = #tpu.dot_dimension_numbers<[1], [0], [0], [1], [0, 0, 1, 1], [], []>} : vector<8x128xbf16>, vector<128x128xbf16>, vector<8x128xf32> -> vector<8x128xf32>
    %c0_42 = arith.constant 0 : index
    %c0_43 = arith.constant 0 : index
    %80 = vector.load %arg7[%c0_42, %c0_43] : memref<1x128xf32, #tpu.memory_space<vmem>>, vector<1x128xf32>
    %81 = vector.broadcast %80 : vector<1x128xf32> to vector<8x128xf32>
    %82 = arith.addf %79, %81 : vector<8x128xf32>
    %83 = arith.truncf %55 : vector<8x128xf32> to vector<8x128xbf16>
    %c0_44 = arith.constant 0 : index
    %c0_45 = arith.constant 0 : index
    %84 = vector.load %arg6[%c0_44, %c0_45] : memref<128x128xbf16, #tpu.memory_space<vmem>>, vector<128x128xbf16>
    %cst_46 = arith.constant dense<0.000000e+00> : vector<8x128xf32>
    %85 = tpu.matmul %83, %84, %cst_46 {dimension_numbers = #tpu.dot_dimension_numbers<[1], [0], [0], [1], [0, 0, 1, 1], [], []>} : vector<8x128xbf16>, vector<128x128xbf16>, vector<8x128xf32> -> vector<8x128xf32>
    %c0_47 = arith.constant 0 : index
    %c0_48 = arith.constant 0 : index
    %86 = vector.load %arg8[%c0_47, %c0_48] : memref<1x128xf32, #tpu.memory_space<vmem>>, vector<1x128xf32>
    %87 = vector.broadcast %86 : vector<1x128xf32> to vector<8x128xf32>
    %88 = arith.addf %85, %87 : vector<8x128xf32>
    %89 = arith.addf %82, %88 : vector<8x128xf32>
    %90 = arith.negf %89 : vector<8x128xf32>
    %91 = math.exp %90 : vector<8x128xf32>
    %cst_49 = arith.constant 1.000000e+00 : f32
    %92 = vector.broadcast %cst_49 : f32 to vector<8x128xf32>
    %93 = arith.addf %92, %91 : vector<8x128xf32>
    %94 = arith.divf %92, %93 : vector<8x128xf32>
    %c64_i32_50 = arith.constant 64 : i32
    %95 = tpu.dynamic_rotate %94 by %c64_i32_50 dim 1 : vector<8x128xf32>, i32 -> vector<8x128xf32>
    %96 = arith.mulf %95, %88 : vector<8x128xf32>
    %97 = arith.addf %82, %96 : vector<8x128xf32>
    %98 = math.tanh %97 : vector<8x128xf32>
    %c32_i32_51 = arith.constant 32 : i32
    %99 = tpu.dynamic_rotate %94 by %c32_i32_51 dim 1 : vector<8x128xf32>, i32 -> vector<8x128xf32>
    %100 = arith.subf %55, %98 : vector<8x128xf32>
    %101 = arith.mulf %99, %100 : vector<8x128xf32>
    %102 = arith.addf %98, %101 : vector<8x128xf32>
    %c16 = arith.constant 16 : index
    %c0_52 = arith.constant 0 : index
    %103 = vector.load %arg12[%c16, %c0_52] : memref<64x128xf32, #tpu.memory_space<vmem>>, vector<8x128xf32>
    %104 = arith.truncf %76 : vector<8x128xf32> to vector<8x128xbf16>
    %c0_53 = arith.constant 0 : index
    %c0_54 = arith.constant 0 : index
    %105 = vector.load %arg2[%c0_53, %c0_54] : memref<128x128xbf16, #tpu.memory_space<vmem>>, vector<128x128xbf16>
    %cst_55 = arith.constant dense<0.000000e+00> : vector<8x128xf32>
    %106 = tpu.matmul %104, %105, %cst_55 {dimension_numbers = #tpu.dot_dimension_numbers<[1], [0], [0], [1], [0, 0, 1, 1], [], []>} : vector<8x128xbf16>, vector<128x128xbf16>, vector<8x128xf32> -> vector<8x128xf32>
    %c0_56 = arith.constant 0 : index
    %c0_57 = arith.constant 0 : index
    %107 = vector.load %arg4[%c0_56, %c0_57] : memref<1x128xf32, #tpu.memory_space<vmem>>, vector<1x128xf32>
    %108 = vector.broadcast %107 : vector<1x128xf32> to vector<8x128xf32>
    %109 = arith.addf %106, %108 : vector<8x128xf32>
    %110 = arith.addf %103, %109 : vector<8x128xf32>
    %111 = arith.negf %110 : vector<8x128xf32>
    %112 = math.exp %111 : vector<8x128xf32>
    %cst_58 = arith.constant 1.000000e+00 : f32
    %113 = vector.broadcast %cst_58 : f32 to vector<8x128xf32>
    %114 = arith.addf %113, %112 : vector<8x128xf32>
    %115 = arith.divf %113, %114 : vector<8x128xf32>
    %c64_i32_59 = arith.constant 64 : i32
    %116 = tpu.dynamic_rotate %115 by %c64_i32_59 dim 1 : vector<8x128xf32>, i32 -> vector<8x128xf32>
    %117 = arith.mulf %116, %109 : vector<8x128xf32>
    %118 = arith.addf %103, %117 : vector<8x128xf32>
    %119 = math.tanh %118 : vector<8x128xf32>
    %c32_i32_60 = arith.constant 32 : i32
    %120 = tpu.dynamic_rotate %115 by %c32_i32_60 dim 1 : vector<8x128xf32>, i32 -> vector<8x128xf32>
    %121 = arith.subf %76, %119 : vector<8x128xf32>
    %122 = arith.mulf %120, %121 : vector<8x128xf32>
    %123 = arith.addf %119, %122 : vector<8x128xf32>
    %124 = arith.truncf %123 : vector<8x128xf32> to vector<8x128xbf16>
    %c0_61 = arith.constant 0 : index
    %c0_62 = arith.constant 0 : index
    %125 = vector.load %arg5[%c0_61, %c0_62] : memref<128x128xbf16, #tpu.memory_space<vmem>>, vector<128x128xbf16>
    %cst_63 = arith.constant dense<0.000000e+00> : vector<8x128xf32>
    %126 = tpu.matmul %124, %125, %cst_63 {dimension_numbers = #tpu.dot_dimension_numbers<[1], [0], [0], [1], [0, 0, 1, 1], [], []>} : vector<8x128xbf16>, vector<128x128xbf16>, vector<8x128xf32> -> vector<8x128xf32>
    %c0_64 = arith.constant 0 : index
    %c0_65 = arith.constant 0 : index
    %127 = vector.load %arg7[%c0_64, %c0_65] : memref<1x128xf32, #tpu.memory_space<vmem>>, vector<1x128xf32>
    %128 = vector.broadcast %127 : vector<1x128xf32> to vector<8x128xf32>
    %129 = arith.addf %126, %128 : vector<8x128xf32>
    %130 = arith.truncf %102 : vector<8x128xf32> to vector<8x128xbf16>
    %c0_66 = arith.constant 0 : index
    %c0_67 = arith.constant 0 : index
    %131 = vector.load %arg6[%c0_66, %c0_67] : memref<128x128xbf16, #tpu.memory_space<vmem>>, vector<128x128xbf16>
    %cst_68 = arith.constant dense<0.000000e+00> : vector<8x128xf32>
    %132 = tpu.matmul %130, %131, %cst_68 {dimension_numbers = #tpu.dot_dimension_numbers<[1], [0], [0], [1], [0, 0, 1, 1], [], []>} : vector<8x128xbf16>, vector<128x128xbf16>, vector<8x128xf32> -> vector<8x128xf32>
    %c0_69 = arith.constant 0 : index
    %c0_70 = arith.constant 0 : index
    %133 = vector.load %arg8[%c0_69, %c0_70] : memref<1x128xf32, #tpu.memory_space<vmem>>, vector<1x128xf32>
    %134 = vector.broadcast %133 : vector<1x128xf32> to vector<8x128xf32>
    %135 = arith.addf %132, %134 : vector<8x128xf32>
    %136 = arith.addf %129, %135 : vector<8x128xf32>
    %137 = arith.negf %136 : vector<8x128xf32>
    %138 = math.exp %137 : vector<8x128xf32>
    %cst_71 = arith.constant 1.000000e+00 : f32
    %139 = vector.broadcast %cst_71 : f32 to vector<8x128xf32>
    %140 = arith.addf %139, %138 : vector<8x128xf32>
    %141 = arith.divf %139, %140 : vector<8x128xf32>
    %c64_i32_72 = arith.constant 64 : i32
    %142 = tpu.dynamic_rotate %141 by %c64_i32_72 dim 1 : vector<8x128xf32>, i32 -> vector<8x128xf32>
    %143 = arith.mulf %142, %135 : vector<8x128xf32>
    %144 = arith.addf %129, %143 : vector<8x128xf32>
    %145 = math.tanh %144 : vector<8x128xf32>
    %c32_i32_73 = arith.constant 32 : i32
    %146 = tpu.dynamic_rotate %141 by %c32_i32_73 dim 1 : vector<8x128xf32>, i32 -> vector<8x128xf32>
    %147 = arith.subf %102, %145 : vector<8x128xf32>
    %148 = arith.mulf %146, %147 : vector<8x128xf32>
    %149 = arith.addf %145, %148 : vector<8x128xf32>
    %c24 = arith.constant 24 : index
    %c0_74 = arith.constant 0 : index
    %150 = vector.load %arg12[%c24, %c0_74] : memref<64x128xf32, #tpu.memory_space<vmem>>, vector<8x128xf32>
    %151 = arith.truncf %123 : vector<8x128xf32> to vector<8x128xbf16>
    %c0_75 = arith.constant 0 : index
    %c0_76 = arith.constant 0 : index
    %152 = vector.load %arg2[%c0_75, %c0_76] : memref<128x128xbf16, #tpu.memory_space<vmem>>, vector<128x128xbf16>
    %cst_77 = arith.constant dense<0.000000e+00> : vector<8x128xf32>
    %153 = tpu.matmul %151, %152, %cst_77 {dimension_numbers = #tpu.dot_dimension_numbers<[1], [0], [0], [1], [0, 0, 1, 1], [], []>} : vector<8x128xbf16>, vector<128x128xbf16>, vector<8x128xf32> -> vector<8x128xf32>
    %c0_78 = arith.constant 0 : index
    %c0_79 = arith.constant 0 : index
    %154 = vector.load %arg4[%c0_78, %c0_79] : memref<1x128xf32, #tpu.memory_space<vmem>>, vector<1x128xf32>
    %155 = vector.broadcast %154 : vector<1x128xf32> to vector<8x128xf32>
    %156 = arith.addf %153, %155 : vector<8x128xf32>
    %157 = arith.addf %150, %156 : vector<8x128xf32>
    %158 = arith.negf %157 : vector<8x128xf32>
    %159 = math.exp %158 : vector<8x128xf32>
    %cst_80 = arith.constant 1.000000e+00 : f32
    %160 = vector.broadcast %cst_80 : f32 to vector<8x128xf32>
    %161 = arith.addf %160, %159 : vector<8x128xf32>
    %162 = arith.divf %160, %161 : vector<8x128xf32>
    %c64_i32_81 = arith.constant 64 : i32
    %163 = tpu.dynamic_rotate %162 by %c64_i32_81 dim 1 : vector<8x128xf32>, i32 -> vector<8x128xf32>
    %164 = arith.mulf %163, %156 : vector<8x128xf32>
    %165 = arith.addf %150, %164 : vector<8x128xf32>
    %166 = math.tanh %165 : vector<8x128xf32>
    %c32_i32_82 = arith.constant 32 : i32
    %167 = tpu.dynamic_rotate %162 by %c32_i32_82 dim 1 : vector<8x128xf32>, i32 -> vector<8x128xf32>
    %168 = arith.subf %123, %166 : vector<8x128xf32>
    %169 = arith.mulf %167, %168 : vector<8x128xf32>
    %170 = arith.addf %166, %169 : vector<8x128xf32>
    %171 = arith.truncf %170 : vector<8x128xf32> to vector<8x128xbf16>
    %c0_83 = arith.constant 0 : index
    %c0_84 = arith.constant 0 : index
    %172 = vector.load %arg5[%c0_83, %c0_84] : memref<128x128xbf16, #tpu.memory_space<vmem>>, vector<128x128xbf16>
    %cst_85 = arith.constant dense<0.000000e+00> : vector<8x128xf32>
    %173 = tpu.matmul %171, %172, %cst_85 {dimension_numbers = #tpu.dot_dimension_numbers<[1], [0], [0], [1], [0, 0, 1, 1], [], []>} : vector<8x128xbf16>, vector<128x128xbf16>, vector<8x128xf32> -> vector<8x128xf32>
    %c0_86 = arith.constant 0 : index
    %c0_87 = arith.constant 0 : index
    %174 = vector.load %arg7[%c0_86, %c0_87] : memref<1x128xf32, #tpu.memory_space<vmem>>, vector<1x128xf32>
    %175 = vector.broadcast %174 : vector<1x128xf32> to vector<8x128xf32>
    %176 = arith.addf %173, %175 : vector<8x128xf32>
    %177 = arith.truncf %149 : vector<8x128xf32> to vector<8x128xbf16>
    %c0_88 = arith.constant 0 : index
    %c0_89 = arith.constant 0 : index
    %178 = vector.load %arg6[%c0_88, %c0_89] : memref<128x128xbf16, #tpu.memory_space<vmem>>, vector<128x128xbf16>
    %cst_90 = arith.constant dense<0.000000e+00> : vector<8x128xf32>
    %179 = tpu.matmul %177, %178, %cst_90 {dimension_numbers = #tpu.dot_dimension_numbers<[1], [0], [0], [1], [0, 0, 1, 1], [], []>} : vector<8x128xbf16>, vector<128x128xbf16>, vector<8x128xf32> -> vector<8x128xf32>
    %c0_91 = arith.constant 0 : index
    %c0_92 = arith.constant 0 : index
    %180 = vector.load %arg8[%c0_91, %c0_92] : memref<1x128xf32, #tpu.memory_space<vmem>>, vector<1x128xf32>
    %181 = vector.broadcast %180 : vector<1x128xf32> to vector<8x128xf32>
    %182 = arith.addf %179, %181 : vector<8x128xf32>
    %183 = arith.addf %176, %182 : vector<8x128xf32>
    %184 = arith.negf %183 : vector<8x128xf32>
    %185 = math.exp %184 : vector<8x128xf32>
    %cst_93 = arith.constant 1.000000e+00 : f32
    %186 = vector.broadcast %cst_93 : f32 to vector<8x128xf32>
    %187 = arith.addf %186, %185 : vector<8x128xf32>
    %188 = arith.divf %186, %187 : vector<8x128xf32>
    %c64_i32_94 = arith.constant 64 : i32
    %189 = tpu.dynamic_rotate %188 by %c64_i32_94 dim 1 : vector<8x128xf32>, i32 -> vector<8x128xf32>
    %190 = arith.mulf %189, %182 : vector<8x128xf32>
    %191 = arith.addf %176, %190 : vector<8x128xf32>
    %192 = math.tanh %191 : vector<8x128xf32>
    %c32_i32_95 = arith.constant 32 : i32
    %193 = tpu.dynamic_rotate %188 by %c32_i32_95 dim 1 : vector<8x128xf32>, i32 -> vector<8x128xf32>
    %194 = arith.subf %149, %192 : vector<8x128xf32>
    %195 = arith.mulf %193, %194 : vector<8x128xf32>
    %196 = arith.addf %192, %195 : vector<8x128xf32>
    %c32 = arith.constant 32 : index
    %c0_96 = arith.constant 0 : index
    %197 = vector.load %arg12[%c32, %c0_96] : memref<64x128xf32, #tpu.memory_space<vmem>>, vector<8x128xf32>
    %198 = arith.truncf %170 : vector<8x128xf32> to vector<8x128xbf16>
    %c0_97 = arith.constant 0 : index
    %c0_98 = arith.constant 0 : index
    %199 = vector.load %arg2[%c0_97, %c0_98] : memref<128x128xbf16, #tpu.memory_space<vmem>>, vector<128x128xbf16>
    %cst_99 = arith.constant dense<0.000000e+00> : vector<8x128xf32>
    %200 = tpu.matmul %198, %199, %cst_99 {dimension_numbers = #tpu.dot_dimension_numbers<[1], [0], [0], [1], [0, 0, 1, 1], [], []>} : vector<8x128xbf16>, vector<128x128xbf16>, vector<8x128xf32> -> vector<8x128xf32>
    %c0_100 = arith.constant 0 : index
    %c0_101 = arith.constant 0 : index
    %201 = vector.load %arg4[%c0_100, %c0_101] : memref<1x128xf32, #tpu.memory_space<vmem>>, vector<1x128xf32>
    %202 = vector.broadcast %201 : vector<1x128xf32> to vector<8x128xf32>
    %203 = arith.addf %200, %202 : vector<8x128xf32>
    %204 = arith.addf %197, %203 : vector<8x128xf32>
    %205 = arith.negf %204 : vector<8x128xf32>
    %206 = math.exp %205 : vector<8x128xf32>
    %cst_102 = arith.constant 1.000000e+00 : f32
    %207 = vector.broadcast %cst_102 : f32 to vector<8x128xf32>
    %208 = arith.addf %207, %206 : vector<8x128xf32>
    %209 = arith.divf %207, %208 : vector<8x128xf32>
    %c64_i32_103 = arith.constant 64 : i32
    %210 = tpu.dynamic_rotate %209 by %c64_i32_103 dim 1 : vector<8x128xf32>, i32 -> vector<8x128xf32>
    %211 = arith.mulf %210, %203 : vector<8x128xf32>
    %212 = arith.addf %197, %211 : vector<8x128xf32>
    %213 = math.tanh %212 : vector<8x128xf32>
    %c32_i32_104 = arith.constant 32 : i32
    %214 = tpu.dynamic_rotate %209 by %c32_i32_104 dim 1 : vector<8x128xf32>, i32 -> vector<8x128xf32>
    %215 = arith.subf %170, %213 : vector<8x128xf32>
    %216 = arith.mulf %214, %215 : vector<8x128xf32>
    %217 = arith.addf %213, %216 : vector<8x128xf32>
    %218 = arith.truncf %217 : vector<8x128xf32> to vector<8x128xbf16>
    %c0_105 = arith.constant 0 : index
    %c0_106 = arith.constant 0 : index
    %219 = vector.load %arg5[%c0_105, %c0_106] : memref<128x128xbf16, #tpu.memory_space<vmem>>, vector<128x128xbf16>
    %cst_107 = arith.constant dense<0.000000e+00> : vector<8x128xf32>
    %220 = tpu.matmul %218, %219, %cst_107 {dimension_numbers = #tpu.dot_dimension_numbers<[1], [0], [0], [1], [0, 0, 1, 1], [], []>} : vector<8x128xbf16>, vector<128x128xbf16>, vector<8x128xf32> -> vector<8x128xf32>
    %c0_108 = arith.constant 0 : index
    %c0_109 = arith.constant 0 : index
    %221 = vector.load %arg7[%c0_108, %c0_109] : memref<1x128xf32, #tpu.memory_space<vmem>>, vector<1x128xf32>
    %222 = vector.broadcast %221 : vector<1x128xf32> to vector<8x128xf32>
    %223 = arith.addf %220, %222 : vector<8x128xf32>
    %224 = arith.truncf %196 : vector<8x128xf32> to vector<8x128xbf16>
    %c0_110 = arith.constant 0 : index
    %c0_111 = arith.constant 0 : index
    %225 = vector.load %arg6[%c0_110, %c0_111] : memref<128x128xbf16, #tpu.memory_space<vmem>>, vector<128x128xbf16>
    %cst_112 = arith.constant dense<0.000000e+00> : vector<8x128xf32>
    %226 = tpu.matmul %224, %225, %cst_112 {dimension_numbers = #tpu.dot_dimension_numbers<[1], [0], [0], [1], [0, 0, 1, 1], [], []>} : vector<8x128xbf16>, vector<128x128xbf16>, vector<8x128xf32> -> vector<8x128xf32>
    %c0_113 = arith.constant 0 : index
    %c0_114 = arith.constant 0 : index
    %227 = vector.load %arg8[%c0_113, %c0_114] : memref<1x128xf32, #tpu.memory_space<vmem>>, vector<1x128xf32>
    %228 = vector.broadcast %227 : vector<1x128xf32> to vector<8x128xf32>
    %229 = arith.addf %226, %228 : vector<8x128xf32>
    %230 = arith.addf %223, %229 : vector<8x128xf32>
    %231 = arith.negf %230 : vector<8x128xf32>
    %232 = math.exp %231 : vector<8x128xf32>
    %cst_115 = arith.constant 1.000000e+00 : f32
    %233 = vector.broadcast %cst_115 : f32 to vector<8x128xf32>
    %234 = arith.addf %233, %232 : vector<8x128xf32>
    %235 = arith.divf %233, %234 : vector<8x128xf32>
    %c64_i32_116 = arith.constant 64 : i32
    %236 = tpu.dynamic_rotate %235 by %c64_i32_116 dim 1 : vector<8x128xf32>, i32 -> vector<8x128xf32>
    %237 = arith.mulf %236, %229 : vector<8x128xf32>
    %238 = arith.addf %223, %237 : vector<8x128xf32>
    %239 = math.tanh %238 : vector<8x128xf32>
    %c32_i32_117 = arith.constant 32 : i32
    %240 = tpu.dynamic_rotate %235 by %c32_i32_117 dim 1 : vector<8x128xf32>, i32 -> vector<8x128xf32>
    %241 = arith.subf %196, %239 : vector<8x128xf32>
    %242 = arith.mulf %240, %241 : vector<8x128xf32>
    %243 = arith.addf %239, %242 : vector<8x128xf32>
    %c40 = arith.constant 40 : index
    %c0_118 = arith.constant 0 : index
    %244 = vector.load %arg12[%c40, %c0_118] : memref<64x128xf32, #tpu.memory_space<vmem>>, vector<8x128xf32>
    %245 = arith.truncf %217 : vector<8x128xf32> to vector<8x128xbf16>
    %c0_119 = arith.constant 0 : index
    %c0_120 = arith.constant 0 : index
    %246 = vector.load %arg2[%c0_119, %c0_120] : memref<128x128xbf16, #tpu.memory_space<vmem>>, vector<128x128xbf16>
    %cst_121 = arith.constant dense<0.000000e+00> : vector<8x128xf32>
    %247 = tpu.matmul %245, %246, %cst_121 {dimension_numbers = #tpu.dot_dimension_numbers<[1], [0], [0], [1], [0, 0, 1, 1], [], []>} : vector<8x128xbf16>, vector<128x128xbf16>, vector<8x128xf32> -> vector<8x128xf32>
    %c0_122 = arith.constant 0 : index
    %c0_123 = arith.constant 0 : index
    %248 = vector.load %arg4[%c0_122, %c0_123] : memref<1x128xf32, #tpu.memory_space<vmem>>, vector<1x128xf32>
    %249 = vector.broadcast %248 : vector<1x128xf32> to vector<8x128xf32>
    %250 = arith.addf %247, %249 : vector<8x128xf32>
    %251 = arith.addf %244, %250 : vector<8x128xf32>
    %252 = arith.negf %251 : vector<8x128xf32>
    %253 = math.exp %252 : vector<8x128xf32>
    %cst_124 = arith.constant 1.000000e+00 : f32
    %254 = vector.broadcast %cst_124 : f32 to vector<8x128xf32>
    %255 = arith.addf %254, %253 : vector<8x128xf32>
    %256 = arith.divf %254, %255 : vector<8x128xf32>
    %c64_i32_125 = arith.constant 64 : i32
    %257 = tpu.dynamic_rotate %256 by %c64_i32_125 dim 1 : vector<8x128xf32>, i32 -> vector<8x128xf32>
    %258 = arith.mulf %257, %250 : vector<8x128xf32>
    %259 = arith.addf %244, %258 : vector<8x128xf32>
    %260 = math.tanh %259 : vector<8x128xf32>
    %c32_i32_126 = arith.constant 32 : i32
    %261 = tpu.dynamic_rotate %256 by %c32_i32_126 dim 1 : vector<8x128xf32>, i32 -> vector<8x128xf32>
    %262 = arith.subf %217, %260 : vector<8x128xf32>
    %263 = arith.mulf %261, %262 : vector<8x128xf32>
    %264 = arith.addf %260, %263 : vector<8x128xf32>
    %265 = arith.truncf %264 : vector<8x128xf32> to vector<8x128xbf16>
    %c0_127 = arith.constant 0 : index
    %c0_128 = arith.constant 0 : index
    %266 = vector.load %arg5[%c0_127, %c0_128] : memref<128x128xbf16, #tpu.memory_space<vmem>>, vector<128x128xbf16>
    %cst_129 = arith.constant dense<0.000000e+00> : vector<8x128xf32>
    %267 = tpu.matmul %265, %266, %cst_129 {dimension_numbers = #tpu.dot_dimension_numbers<[1], [0], [0], [1], [0, 0, 1, 1], [], []>} : vector<8x128xbf16>, vector<128x128xbf16>, vector<8x128xf32> -> vector<8x128xf32>
    %c0_130 = arith.constant 0 : index
    %c0_131 = arith.constant 0 : index
    %268 = vector.load %arg7[%c0_130, %c0_131] : memref<1x128xf32, #tpu.memory_space<vmem>>, vector<1x128xf32>
    %269 = vector.broadcast %268 : vector<1x128xf32> to vector<8x128xf32>
    %270 = arith.addf %267, %269 : vector<8x128xf32>
    %271 = arith.truncf %243 : vector<8x128xf32> to vector<8x128xbf16>
    %c0_132 = arith.constant 0 : index
    %c0_133 = arith.constant 0 : index
    %272 = vector.load %arg6[%c0_132, %c0_133] : memref<128x128xbf16, #tpu.memory_space<vmem>>, vector<128x128xbf16>
    %cst_134 = arith.constant dense<0.000000e+00> : vector<8x128xf32>
    %273 = tpu.matmul %271, %272, %cst_134 {dimension_numbers = #tpu.dot_dimension_numbers<[1], [0], [0], [1], [0, 0, 1, 1], [], []>} : vector<8x128xbf16>, vector<128x128xbf16>, vector<8x128xf32> -> vector<8x128xf32>
    %c0_135 = arith.constant 0 : index
    %c0_136 = arith.constant 0 : index
    %274 = vector.load %arg8[%c0_135, %c0_136] : memref<1x128xf32, #tpu.memory_space<vmem>>, vector<1x128xf32>
    %275 = vector.broadcast %274 : vector<1x128xf32> to vector<8x128xf32>
    %276 = arith.addf %273, %275 : vector<8x128xf32>
    %277 = arith.addf %270, %276 : vector<8x128xf32>
    %278 = arith.negf %277 : vector<8x128xf32>
    %279 = math.exp %278 : vector<8x128xf32>
    %cst_137 = arith.constant 1.000000e+00 : f32
    %280 = vector.broadcast %cst_137 : f32 to vector<8x128xf32>
    %281 = arith.addf %280, %279 : vector<8x128xf32>
    %282 = arith.divf %280, %281 : vector<8x128xf32>
    %c64_i32_138 = arith.constant 64 : i32
    %283 = tpu.dynamic_rotate %282 by %c64_i32_138 dim 1 : vector<8x128xf32>, i32 -> vector<8x128xf32>
    %284 = arith.mulf %283, %276 : vector<8x128xf32>
    %285 = arith.addf %270, %284 : vector<8x128xf32>
    %286 = math.tanh %285 : vector<8x128xf32>
    %c32_i32_139 = arith.constant 32 : i32
    %287 = tpu.dynamic_rotate %282 by %c32_i32_139 dim 1 : vector<8x128xf32>, i32 -> vector<8x128xf32>
    %288 = arith.subf %243, %286 : vector<8x128xf32>
    %289 = arith.mulf %287, %288 : vector<8x128xf32>
    %290 = arith.addf %286, %289 : vector<8x128xf32>
    %c48 = arith.constant 48 : index
    %c0_140 = arith.constant 0 : index
    %291 = vector.load %arg12[%c48, %c0_140] : memref<64x128xf32, #tpu.memory_space<vmem>>, vector<8x128xf32>
    %292 = arith.truncf %264 : vector<8x128xf32> to vector<8x128xbf16>
    %c0_141 = arith.constant 0 : index
    %c0_142 = arith.constant 0 : index
    %293 = vector.load %arg2[%c0_141, %c0_142] : memref<128x128xbf16, #tpu.memory_space<vmem>>, vector<128x128xbf16>
    %cst_143 = arith.constant dense<0.000000e+00> : vector<8x128xf32>
    %294 = tpu.matmul %292, %293, %cst_143 {dimension_numbers = #tpu.dot_dimension_numbers<[1], [0], [0], [1], [0, 0, 1, 1], [], []>} : vector<8x128xbf16>, vector<128x128xbf16>, vector<8x128xf32> -> vector<8x128xf32>
    %c0_144 = arith.constant 0 : index
    %c0_145 = arith.constant 0 : index
    %295 = vector.load %arg4[%c0_144, %c0_145] : memref<1x128xf32, #tpu.memory_space<vmem>>, vector<1x128xf32>
    %296 = vector.broadcast %295 : vector<1x128xf32> to vector<8x128xf32>
    %297 = arith.addf %294, %296 : vector<8x128xf32>
    %298 = arith.addf %291, %297 : vector<8x128xf32>
    %299 = arith.negf %298 : vector<8x128xf32>
    %300 = math.exp %299 : vector<8x128xf32>
    %cst_146 = arith.constant 1.000000e+00 : f32
    %301 = vector.broadcast %cst_146 : f32 to vector<8x128xf32>
    %302 = arith.addf %301, %300 : vector<8x128xf32>
    %303 = arith.divf %301, %302 : vector<8x128xf32>
    %c64_i32_147 = arith.constant 64 : i32
    %304 = tpu.dynamic_rotate %303 by %c64_i32_147 dim 1 : vector<8x128xf32>, i32 -> vector<8x128xf32>
    %305 = arith.mulf %304, %297 : vector<8x128xf32>
    %306 = arith.addf %291, %305 : vector<8x128xf32>
    %307 = math.tanh %306 : vector<8x128xf32>
    %c32_i32_148 = arith.constant 32 : i32
    %308 = tpu.dynamic_rotate %303 by %c32_i32_148 dim 1 : vector<8x128xf32>, i32 -> vector<8x128xf32>
    %309 = arith.subf %264, %307 : vector<8x128xf32>
    %310 = arith.mulf %308, %309 : vector<8x128xf32>
    %311 = arith.addf %307, %310 : vector<8x128xf32>
    %312 = arith.truncf %311 : vector<8x128xf32> to vector<8x128xbf16>
    %c0_149 = arith.constant 0 : index
    %c0_150 = arith.constant 0 : index
    %313 = vector.load %arg5[%c0_149, %c0_150] : memref<128x128xbf16, #tpu.memory_space<vmem>>, vector<128x128xbf16>
    %cst_151 = arith.constant dense<0.000000e+00> : vector<8x128xf32>
    %314 = tpu.matmul %312, %313, %cst_151 {dimension_numbers = #tpu.dot_dimension_numbers<[1], [0], [0], [1], [0, 0, 1, 1], [], []>} : vector<8x128xbf16>, vector<128x128xbf16>, vector<8x128xf32> -> vector<8x128xf32>
    %c0_152 = arith.constant 0 : index
    %c0_153 = arith.constant 0 : index
    %315 = vector.load %arg7[%c0_152, %c0_153] : memref<1x128xf32, #tpu.memory_space<vmem>>, vector<1x128xf32>
    %316 = vector.broadcast %315 : vector<1x128xf32> to vector<8x128xf32>
    %317 = arith.addf %314, %316 : vector<8x128xf32>
    %318 = arith.truncf %290 : vector<8x128xf32> to vector<8x128xbf16>
    %c0_154 = arith.constant 0 : index
    %c0_155 = arith.constant 0 : index
    %319 = vector.load %arg6[%c0_154, %c0_155] : memref<128x128xbf16, #tpu.memory_space<vmem>>, vector<128x128xbf16>
    %cst_156 = arith.constant dense<0.000000e+00> : vector<8x128xf32>
    %320 = tpu.matmul %318, %319, %cst_156 {dimension_numbers = #tpu.dot_dimension_numbers<[1], [0], [0], [1], [0, 0, 1, 1], [], []>} : vector<8x128xbf16>, vector<128x128xbf16>, vector<8x128xf32> -> vector<8x128xf32>
    %c0_157 = arith.constant 0 : index
    %c0_158 = arith.constant 0 : index
    %321 = vector.load %arg8[%c0_157, %c0_158] : memref<1x128xf32, #tpu.memory_space<vmem>>, vector<1x128xf32>
    %322 = vector.broadcast %321 : vector<1x128xf32> to vector<8x128xf32>
    %323 = arith.addf %320, %322 : vector<8x128xf32>
    %324 = arith.addf %317, %323 : vector<8x128xf32>
    %325 = arith.negf %324 : vector<8x128xf32>
    %326 = math.exp %325 : vector<8x128xf32>
    %cst_159 = arith.constant 1.000000e+00 : f32
    %327 = vector.broadcast %cst_159 : f32 to vector<8x128xf32>
    %328 = arith.addf %327, %326 : vector<8x128xf32>
    %329 = arith.divf %327, %328 : vector<8x128xf32>
    %c64_i32_160 = arith.constant 64 : i32
    %330 = tpu.dynamic_rotate %329 by %c64_i32_160 dim 1 : vector<8x128xf32>, i32 -> vector<8x128xf32>
    %331 = arith.mulf %330, %323 : vector<8x128xf32>
    %332 = arith.addf %317, %331 : vector<8x128xf32>
    %333 = math.tanh %332 : vector<8x128xf32>
    %c32_i32_161 = arith.constant 32 : i32
    %334 = tpu.dynamic_rotate %329 by %c32_i32_161 dim 1 : vector<8x128xf32>, i32 -> vector<8x128xf32>
    %335 = arith.subf %290, %333 : vector<8x128xf32>
    %336 = arith.mulf %334, %335 : vector<8x128xf32>
    %337 = arith.addf %333, %336 : vector<8x128xf32>
    %c56 = arith.constant 56 : index
    %c0_162 = arith.constant 0 : index
    %338 = vector.load %arg12[%c56, %c0_162] : memref<64x128xf32, #tpu.memory_space<vmem>>, vector<8x128xf32>
    %339 = arith.truncf %311 : vector<8x128xf32> to vector<8x128xbf16>
    %c0_163 = arith.constant 0 : index
    %c0_164 = arith.constant 0 : index
    %340 = vector.load %arg2[%c0_163, %c0_164] : memref<128x128xbf16, #tpu.memory_space<vmem>>, vector<128x128xbf16>
    %cst_165 = arith.constant dense<0.000000e+00> : vector<8x128xf32>
    %341 = tpu.matmul %339, %340, %cst_165 {dimension_numbers = #tpu.dot_dimension_numbers<[1], [0], [0], [1], [0, 0, 1, 1], [], []>} : vector<8x128xbf16>, vector<128x128xbf16>, vector<8x128xf32> -> vector<8x128xf32>
    %c0_166 = arith.constant 0 : index
    %c0_167 = arith.constant 0 : index
    %342 = vector.load %arg4[%c0_166, %c0_167] : memref<1x128xf32, #tpu.memory_space<vmem>>, vector<1x128xf32>
    %343 = vector.broadcast %342 : vector<1x128xf32> to vector<8x128xf32>
    %344 = arith.addf %341, %343 : vector<8x128xf32>
    %345 = arith.addf %338, %344 : vector<8x128xf32>
    %346 = arith.negf %345 : vector<8x128xf32>
    %347 = math.exp %346 : vector<8x128xf32>
    %cst_168 = arith.constant 1.000000e+00 : f32
    %348 = vector.broadcast %cst_168 : f32 to vector<8x128xf32>
    %349 = arith.addf %348, %347 : vector<8x128xf32>
    %350 = arith.divf %348, %349 : vector<8x128xf32>
    %c64_i32_169 = arith.constant 64 : i32
    %351 = tpu.dynamic_rotate %350 by %c64_i32_169 dim 1 : vector<8x128xf32>, i32 -> vector<8x128xf32>
    %352 = arith.mulf %351, %344 : vector<8x128xf32>
    %353 = arith.addf %338, %352 : vector<8x128xf32>
    %354 = math.tanh %353 : vector<8x128xf32>
    %c32_i32_170 = arith.constant 32 : i32
    %355 = tpu.dynamic_rotate %350 by %c32_i32_170 dim 1 : vector<8x128xf32>, i32 -> vector<8x128xf32>
    %356 = arith.subf %311, %354 : vector<8x128xf32>
    %357 = arith.mulf %355, %356 : vector<8x128xf32>
    %358 = arith.addf %354, %357 : vector<8x128xf32>
    %359 = arith.truncf %358 : vector<8x128xf32> to vector<8x128xbf16>
    %c0_171 = arith.constant 0 : index
    %c0_172 = arith.constant 0 : index
    %360 = vector.load %arg5[%c0_171, %c0_172] : memref<128x128xbf16, #tpu.memory_space<vmem>>, vector<128x128xbf16>
    %cst_173 = arith.constant dense<0.000000e+00> : vector<8x128xf32>
    %361 = tpu.matmul %359, %360, %cst_173 {dimension_numbers = #tpu.dot_dimension_numbers<[1], [0], [0], [1], [0, 0, 1, 1], [], []>} : vector<8x128xbf16>, vector<128x128xbf16>, vector<8x128xf32> -> vector<8x128xf32>
    %c0_174 = arith.constant 0 : index
    %c0_175 = arith.constant 0 : index
    %362 = vector.load %arg7[%c0_174, %c0_175] : memref<1x128xf32, #tpu.memory_space<vmem>>, vector<1x128xf32>
    %363 = vector.broadcast %362 : vector<1x128xf32> to vector<8x128xf32>
    %364 = arith.addf %361, %363 : vector<8x128xf32>
    %365 = arith.truncf %337 : vector<8x128xf32> to vector<8x128xbf16>
    %c0_176 = arith.constant 0 : index
    %c0_177 = arith.constant 0 : index
    %366 = vector.load %arg6[%c0_176, %c0_177] : memref<128x128xbf16, #tpu.memory_space<vmem>>, vector<128x128xbf16>
    %cst_178 = arith.constant dense<0.000000e+00> : vector<8x128xf32>
    %367 = tpu.matmul %365, %366, %cst_178 {dimension_numbers = #tpu.dot_dimension_numbers<[1], [0], [0], [1], [0, 0, 1, 1], [], []>} : vector<8x128xbf16>, vector<128x128xbf16>, vector<8x128xf32> -> vector<8x128xf32>
    %c0_179 = arith.constant 0 : index
    %c0_180 = arith.constant 0 : index
    %368 = vector.load %arg8[%c0_179, %c0_180] : memref<1x128xf32, #tpu.memory_space<vmem>>, vector<1x128xf32>
    %369 = vector.broadcast %368 : vector<1x128xf32> to vector<8x128xf32>
    %370 = arith.addf %367, %369 : vector<8x128xf32>
    %371 = arith.addf %364, %370 : vector<8x128xf32>
    %372 = arith.negf %371 : vector<8x128xf32>
    %373 = math.exp %372 : vector<8x128xf32>
    %cst_181 = arith.constant 1.000000e+00 : f32
    %374 = vector.broadcast %cst_181 : f32 to vector<8x128xf32>
    %375 = arith.addf %374, %373 : vector<8x128xf32>
    %376 = arith.divf %374, %375 : vector<8x128xf32>
    %c64_i32_182 = arith.constant 64 : i32
    %377 = tpu.dynamic_rotate %376 by %c64_i32_182 dim 1 : vector<8x128xf32>, i32 -> vector<8x128xf32>
    %378 = arith.mulf %377, %370 : vector<8x128xf32>
    %379 = arith.addf %364, %378 : vector<8x128xf32>
    %380 = math.tanh %379 : vector<8x128xf32>
    %c32_i32_183 = arith.constant 32 : i32
    %381 = tpu.dynamic_rotate %376 by %c32_i32_183 dim 1 : vector<8x128xf32>, i32 -> vector<8x128xf32>
    %382 = arith.subf %337, %380 : vector<8x128xf32>
    %383 = arith.mulf %381, %382 : vector<8x128xf32>
    %384 = arith.addf %380, %383 : vector<8x128xf32>
    %385 = arith.truncf %384 : vector<8x128xf32> to vector<8x128xbf16>
    %c0_184 = arith.constant 0 : index
    %c0_185 = arith.constant 0 : index
    %386 = vector.load %arg9[%c0_184, %c0_185] : memref<128x1xbf16, #tpu.memory_space<vmem>>, vector<128x1xbf16>
    %cst_186 = arith.constant dense<0.000000e+00> : vector<8x1xf32>
    %387 = tpu.matmul %385, %386, %cst_186 {dimension_numbers = #tpu.dot_dimension_numbers<[1], [0], [0], [1], [0, 0, 1, 1], [], []>} : vector<8x128xbf16>, vector<128x1xbf16>, vector<8x1xf32> -> vector<8x1xf32>
    %c0_187 = arith.constant 0 : index
    %c0_188 = arith.constant 0 : index
    %388 = vector.load %arg10[%c0_187, %c0_188] : memref<1x1xf32, #tpu.memory_space<vmem>>, vector<1x1xf32>
    %389 = vector.broadcast %388 : vector<1x1xf32> to vector<8x1xf32>
    %390 = arith.addf %387, %389 : vector<8x1xf32>
    %391 = vector.extract_strided_slice %390 {offsets = [0, 0], sizes = [4, 1], strides = [1, 1]} : vector<8x1xf32> to vector<4x1xf32>
    %c0_189 = arith.constant 0 : index
    %c0_190 = arith.constant 0 : index
    %392 = vector.load %arg11[%c0_189, %c0_190] : memref<4x1xf32, #tpu.memory_space<vmem>>, vector<4x1xf32>
    tpu.vector_store %arg11[%c0_189, %c0_190], %391 {strides = array<i32>} : memref<4x1xf32, #tpu.memory_space<vmem>>, vector<4x1xf32>,
    return
  }
}

</mosaic_0001>

<bundles_post_ra>
// kernel: gru_model_forward.1
= control target key start
LH: loop header
LB: loop body
LE: loop exit
PB: predicated region body
PF: predicated region fallthrough
CT: control target
= control target key end

     0   :  { %v2720_v0 = vmov 0.0   ;;  %vm2721_vm0 = vmmov 0   ;;  %vm90_vm1 = vcmask 1043456   ;;  %vm77_vm2 = vcmask 64512   ;;  %s2723_s30 = smov 64   ;;  %s2724_s15 = smov 32   ;;  %s3721_s2 = inlined_call_operand.vmem [shape: bf16[128,128], index: 2, kind: input, shape index: {}]   ;;  %s3722_s1 = inlined_call_operand.vmem [shape: bf16[8,128], index: 1, kind: input, shape index: {}]   ;;  %s3723_s0 = inlined_call_operand.vmem [shape: bf16[64,8], index: 0, kind: input, shape index: {}]   ;;  %s3724_s5 = inlined_call_operand.vmem [shape: bf16[128,128], index: 5, kind: input, shape index: {}]   ;;  %s3725_s6 = inlined_call_operand.vmem [shape: bf16[128,128], index: 6, kind: input, shape index: {}]   ;;  %s3726_s3 = inlined_call_operand.vmem [shape: f32[1,128], index: 3, kind: input, shape index: {}]   ;;  %s3727_s4 = inlined_call_operand.vmem [shape: f32[1,128], index: 4, kind: input, shape index: {}]   ;;  %s3728_s8 = inlined_call_operand.vmem [shape: f32[1,128], index: 8, kind: input, shape index: {}]   ;;  %s3729_s7 = inlined_call_operand.vmem [shape: f32[1,128], index: 7, kind: input, shape index: {}]   ;;  %s3730_s9 = inlined_call_operand.vmem [shape: bf16[128,1], index: 9, kind: input, shape index: {}]   ;;  %s3731_s10 = inlined_call_operand.<no memory space> [shape: f32[1,1], index: 10, kind: input, shape index: {}]   ;;  %s3732_s11 = inlined_call_operand.vmem [shape: f32[4,1], index: 11, kind: output, shape index: {}]  }
   0x1   :  { %2054 = vmatprep.subr.bf16.mxu1 %v2720_v0  ;;  %v2789_v1 = vld [vmem:[%s3721_s2] sm:$0xff]   ;;  %2070 = vmatprep.mubr.msk.bf16.mxu1 %vm2721_vm0, %v2720_v0  ;;  %v2797_v2 = vld [vmem:[%s3721_s2 + $0x8] sm:$0xff]   ;;  %v2803_v3 = vld [vmem:[%s3721_s2 + $0x10] sm:$0xff]   ;;  %v2722_v13 = vmov 0   ;;  %vm1747_vm3 = vcmask 3072  }
   0x2   :  { %2055 = vmatpush3.bf16.msra.mxu1 %v2789_v1  ;;  %v49_v4 = vld [vmem:[%s3722_s1] sm:$0xf]  ;;  %v2568_v7 = vld [vmem:[%s3723_s0 + $0x8] sm:$0xff]   ;;  %v2821_v8 = vld [vmem:[%s3721_s2 + $0x18] sm:$0xff]  }
   0x3   :  { %2056 = vmatprep.subr.bf16.mxu1 %v2720_v0  ;;  %2554 = vmatprep.subr.msk.bf16.mxu0 %vm90_vm1, %v49_v4  ;;  %v92_v5 = vsel %vm90_vm1, %v49_v4, 0  ;;  %v2567_v6 = vld [vmem:[%s3723_s0] sm:$0xff]   ;;  %v2837_v10 = vld [vmem:[%s3721_s2 + $0x28] sm:$0xff]   ;;  %v2844_v11 = vld [vmem:[%s3721_s2 + $0x30] sm:$0xff]  }
   0x4   :  { %2045 = vmatpush3.bf16.msra.mxu0 %v92_v5  ;;  %2046 = vmatprep.mubr.msk.bf16.mxu0 %vm77_vm2, %v2567_v6  ;;  %v2830_v9 = vld [vmem:[%s3721_s2 + $0x20] sm:$0xff]   ;;  %v2851_v12 = vld [vmem:[%s3721_s2 + $0x38] sm:$0xff]   ;;  %v2873_v16 = vld [vmem:[%s3724_s5 + $0x8] sm:$0xff]  }
   0x5   :  { %2074 = vmatprep.subr.bf16.mxu0 %v2720_v0  ;;  %v2862_v14 = vld [vmem:[%s3724_s5] sm:$0xff]   ;;  %v2880_v17 = vld [vmem:[%s3725_s6 + $0x8] sm:$0xff]   ;;  %v2886_v18 = vld [vmem:[%s3724_s5 + $0x10] sm:$0xff]  }
   0x6   :  { %2057 = vmatpush3.bf16.msra.mxu1 %v2797_v2  ;;  %v2867_v15 = vld [vmem:[%s3725_s6] sm:$0xff]   ;;  %v2921_v33 = vld [vmem:[%s3725_s6 + $0x10] sm:$0xff]   ;;  %v2927_v36 = vld [vmem:[%s3724_s5 + $0x18] sm:$0xff]  }
   0x7   :  { %2058 = vmatprep.subr.bf16.mxu1 %v2720_v0  ;;  %2047 = vmatmul.mubr.msk.bf16.vlgmr.msra.gmra.mrb[0].mxu0 %vm77_vm2, %v2568_v7  ;;  %v2903_v23 = vld [vmem:[%s3726_s3] ss:$0 sm:$0xff]  ;;  %v2933_v37 = vld [vmem:[%s3725_s6 + $0x18] sm:$0xff]   ;;  %v2580_v40 = vld [vmem:[%s3723_s0 + $0x10] sm:$0xff]  }
   0x8   :  { %2075 = vmatpush3.bf16.msra.mxu0 %v2862_v14  ;;  %v2908_v24 = vld [vmem:[%s3727_s4] ss:$0 sm:$0xff]  ;;  %v2958_v41 = vld [vmem:[%s3724_s5 + $0x28] sm:$0xff]   ;;  %v2582_v42 = vld [vmem:[%s3723_s0 + $0x18] sm:$0xff]   ;;  %2050 = vmatprep.mubr.msk.bf16.mxu0 %vm77_vm2, %v2580_v40 }
   0x9   :  { %2076 = vmatprep.subr.bf16.mxu0 %v2720_v0  ;;  %v2941_v38 = vld [vmem:[%s3724_s5 + $0x20] sm:$0xff]   ;;  %v2967_v43 = vld [vmem:[%s3725_s6 + $0x28] sm:$0xff]   ;;  %v2978_v45 = vld [vmem:[%s3724_s5 + $0x30] sm:$0xff]  }
   0xa   :  { %2059 = vmatpush3.bf16.msra.mxu1 %v2803_v3  ;;  %v2947_v39 = vld [vmem:[%s3725_s6 + $0x20] sm:$0xff]   ;;  %v2984_v46 = vld [vmem:[%s3725_s6 + $0x30] sm:$0xff]   ;;  %v2995_v47 = vld [vmem:[%s3724_s5 + $0x38] sm:$0xff]  }
   0xb   :  { %2060 = vmatprep.subr.bf16.mxu1 %v2720_v0  ;;  %v3001_v48 = vld [vmem:[%s3725_s6 + $0x38] sm:$0xff]   ;;  %v3079_v6 = vld [vmem:[%s3728_s8] ss:$0 sm:$0xff] }
   0xc   :  { %2077 = vmatpush3.bf16.msra.mxu0 %v2873_v16  ;;  %v3084_v7 = vld [vmem:[%s3729_s7] ss:$0 sm:$0xff] }
   0xd   :  { %2078 = vmatprep.subr.bf16.mxu0 %v2720_v0 }
   0xe   :  { %2061 = vmatpush3.bf16.msra.mxu1 %v2821_v8 }
   0xf   :  { %2062 = vmatprep.subr.bf16.mxu1 %v2720_v0  ;;  %2051 = vmatmul.mubr.msk.bf16.gmra.mrb[4].mxu0 %vm77_vm2, %v2582_v42 }
  0x10   :  { %2079 = vmatpush3.bf16.msra.mxu0 %v2886_v18  ;;  %2090 = vmatprep.mubr.msk.bf16.mxu0 %vm2721_vm0, %v2720_v0 }
  0x11   :  { %2080 = vmatprep.subr.bf16.mxu0 %v2720_v0 }
  0x12   :  { %2063 = vmatpush3.bf16.msra.mxu1 %v2830_v9 }
  0x13   :  { %2064 = vmatprep.subr.bf16.mxu1 %v2720_v0 }
  0x14   :  { %2081 = vmatpush3.bf16.msra.mxu0 %v2927_v36 }
  0x15   :  { %2082 = vmatprep.subr.bf16.mxu0 %v2720_v0 }
  0x16   :  { %2065 = vmatpush3.bf16.msra.mxu1 %v2837_v10 }
  0x17   :  { %2066 = vmatprep.subr.bf16.mxu1 %v2720_v0 }
  0x18   :  { %2083 = vmatpush3.bf16.msra.mxu0 %v2941_v38 }
  0x19   :  { %2084 = vmatprep.subr.bf16.mxu0 %v2720_v0 }
  0x1a   :  { %2067 = vmatpush3.bf16.msra.mxu1 %v2844_v11 }
  0x1b   :  { %2068 = vmatprep.subr.bf16.mxu1 %v2720_v0 }
  0x1c   :  { %2085 = vmatpush3.bf16.msra.mxu0 %v2958_v41 }
  0x1d   :  { %2086 = vmatprep.subr.bf16.mxu0 %v2720_v0 }
  0x1e   :  { %2069 = vmatpush3.bf16.msra.mxu1 %v2851_v12 }
  0x1f   :  { %2094 = vmatprep.subr.bf16.mxu1 %v2720_v0 }
  0x20   :  { %2087 = vmatpush3.bf16.msra.mxu0 %v2978_v45 }
  0x21   :  { %2071 = vmatmul.mubr.bf16.vlgmr.msra.gmra.mrb[0].mxu1 %v2722_v13  ;;  %2088 = vmatprep.subr.bf16.mxu0 %v2720_v0 }
  0x22   :  { %2110 = vmatprep.mubr.msk.bf16.mxu1 %vm2721_vm0, %v2720_v0  ;;  %2095 = vmatpush3.bf16.msra.mxu1 %v2867_v15 }
  0x23   :  { %2096 = vmatprep.subr.bf16.mxu1 %v2720_v0 }
  0x24   :  { %2089 = vmatpush3.bf16.msra.mxu0 %v2995_v47 }
  0x25   :  { %2114 = vmatprep.subr.bf16.mxu0 %v2720_v0 }
  0x26   :  { %2097 = vmatpush3.bf16.msra.mxu1 %v2880_v17 }
  0x27   :  { %2098 = vmatprep.subr.bf16.mxu1 %v2720_v0 }
  0x2a   :  { %2099 = vmatpush3.bf16.msra.mxu1 %v2921_v33 }
  0x2b   :  { %2100 = vmatprep.subr.bf16.mxu1 %v2720_v0 }
  0x2e   :  { %2101 = vmatpush3.bf16.msra.mxu1 %v2933_v37 }
  0x2f   :  { %2102 = vmatprep.subr.bf16.mxu1 %v2720_v0 }
  0x32   :  { %2103 = vmatpush3.bf16.msra.mxu1 %v2947_v39 }
  0x33   :  { %2104 = vmatprep.subr.bf16.mxu1 %v2720_v0 }
  0x36   :  { %2105 = vmatpush3.bf16.msra.mxu1 %v2967_v43 }
  0x37   :  { %2106 = vmatprep.subr.bf16.mxu1 %v2720_v0 }
  0x3a   :  { %2107 = vmatpush3.bf16.msra.mxu1 %v2984_v46 }
  0x3b   :  { %2108 = vmatprep.subr.bf16.mxu1 %v2720_v0 }
  0x3e   :  { %2109 = vmatpush3.bf16.msra.mxu1 %v3001_v48 }
  0x3f   :  { %2134 = vmatprep.subr.bf16.mxu1 %v2720_v0 }
  0x41   :  { %2111 = vmatmul.mubr.bf16.vlgmr.msra.gmra.mrb[4].mxu1 %v2722_v13 }
  0x42   :  { %2135 = vmatpush3.bf16.msra.mxu1 %v2862_v14  ;;  %2150 = vmatprep.mubr.msk.bf16.mxu1 %vm2721_vm0, %v2720_v0 }
  0x43   :  { %2136 = vmatprep.subr.bf16.mxu1 %v2720_v0 }
  0x46   :  { %2137 = vmatpush3.bf16.msra.mxu1 %v2873_v16 }
  0x47   :  { %2138 = vmatprep.subr.bf16.mxu1 %v2720_v0 }
  0x4a   :  { %2139 = vmatpush3.bf16.msra.mxu1 %v2886_v18 }
  0x4b   :  { %2140 = vmatprep.subr.bf16.mxu1 %v2720_v0 }
  0x4e   :  { %2141 = vmatpush3.bf16.msra.mxu1 %v2927_v36 }
  0x4f   :  { %2142 = vmatprep.subr.bf16.mxu1 %v2720_v0 }
  0x52   :  { %2143 = vmatpush3.bf16.msra.mxu1 %v2941_v38 }
  0x53   :  { %2144 = vmatprep.subr.bf16.mxu1 %v2720_v0 }
  0x56   :  { %2145 = vmatpush3.bf16.msra.mxu1 %v2958_v41 }
  0x57   :  { %2146 = vmatprep.subr.bf16.mxu1 %v2720_v0 }
  0x5a   :  { %2147 = vmatpush3.bf16.msra.mxu1 %v2978_v45 }
  0x5b   :  { %2148 = vmatprep.subr.bf16.mxu1 %v2720_v0 }
  0x5e   :  { %2149 = vmatpush3.bf16.msra.mxu1 %v2995_v47 }
  0x5f   :  { %2174 = vmatprep.subr.bf16.mxu1 %v2720_v0 }
  0xda   :  { %v2894_v19 = vpop.f32.mrb[0].mxu0 }
  0xdb   :  { %v128_v20 = vpop.f32.mrb[1].mxu0 }
  0xdc   :  { %v2896_v21 = vpop.f32.mrb[2].mxu0  ;;  %v2911_v25 = vadd.f32 %v2903_v23, %v128_v20 }
  0xdd   :  { %v2898_v22 = vpop.f32.mrb[3].mxu0 }
  0xde   :  { %v132_v40 = vadd.f32 %v2903_v23, %v2898_v22 }
  0xe2   :  { %v3068_v58 = vpop.f32.mrb[4].mxu0 }
  0xe3   :  { %v3070_v59 = vpop.f32.mrb[5].mxu0 }
  0xe4   :  { %v3072_v60 = vpop.f32.mrb[6].mxu0 }
  0xe5   :  { %v3074_v61 = vpop.f32.mrb[7].mxu0 }
  0xf4   :  { %v273_v26 = vpop.f32.mrb[0].mxu1 }
  0xf5   :  { %v2914_v27 = vadd.f32 %v2908_v24, %v273_v26  ;;  %v2072_v28 = vpop.f32.mrb[1].mxu1 }
  0xf6   :  { %v276_v29 = vpop.f32.mrb[2].mxu1 }
  0xf7   :  { %v279_v30 = vadd.f32 %v2914_v27, %v2911_v25  ;;  %v2073_v31 = vpop.f32.mrb[3].mxu1 }
  0xf9   :  { %v1771_v32 = vmul.f32 -1.442695, %v279_v30 }
  0xfb   :  { %2596 = vpow2.f32 %v1771_v32 }
 0x105   :  { %v2597_v34 = vpop.eup %2596 }
 0x106   :  { %v283_v35 = vadd.f32 1.0, %v2597_v34 }
 0x108   :  { %2598 = vrcp.f32 %v283_v35 }
 0x112   :  { %v2599_v44 = vpop.eup %2598 }
 0x113   :  { %286 = vrot.lane.b32.xlu0 %v2599_v44, %s2723_s30 }
 0x114   :  { %v513_v62 = vpop.f32.mrb[4].mxu1 }
 0x115   :  { %v2112_v63 = vpop.f32.mrb[5].mxu1  ;;  %v514_v13 = vadd.f32 %v3079_v6, %v513_v62 }
 0x116   :  { %v516_v4 = vpop.f32.mrb[6].mxu1 }
 0x117   :  { %291 = vrot.lane.b32.xlu0 %v2599_v44, %s2724_s15  ;;  %v2113_v5 = vpop.f32.mrb[7].mxu1 }
 0x185   :  { %v287_v49 = vpop.permute.xlu0 %286 }
 0x186   :  { %v288_v50 = vmul.f32 %v287_v49, %v2914_v27 }
 0x188   :  { %v289_v51 = vadd.f32 %v288_v50, %v2911_v25 }
 0x189   :  { %v292_v54 = vpop.permute.xlu0 %291 }
 0x18a   :  { %2600 = vtanh.f32 %v289_v51 }
 0x194   :  { %v2601_v52 = vpop.eup %2600 }
 0x195   :  { %v293_v53 = vsub.f32 0.0, %v2601_v52 }
 0x197   :  { %v294_v55 = vmul.f32 %v293_v53, %v292_v54 }
 0x199   :  { %v3028_v56 = vadd.f32 %v2601_v52, %v294_v55 }
 0x19b   :  { %v296_v57 = vpack.c.bf16 %v3028_v56, %v3028_v56 }
 0x19d   :  { %2091 = vmatmul.mubr.bf16.vlgmr.msra.gmra.mrb[8].mxu0 %v296_v57 }
 0x19e   :  { %2115 = vmatpush3.bf16.msra.mxu0 %v2789_v1  ;;  %2130 = vmatprep.mubr.msk.bf16.mxu0 %vm2721_vm0, %v2720_v0 }
 0x19f   :  { %2116 = vmatprep.subr.bf16.mxu0 %v2720_v0 }
 0x1a2   :  { %2117 = vmatpush3.bf16.msra.mxu0 %v2797_v2 }
 0x1a3   :  { %2118 = vmatprep.subr.bf16.mxu0 %v2720_v0 }
 0x1a6   :  { %2119 = vmatpush3.bf16.msra.mxu0 %v2803_v3 }
 0x1a7   :  { %2120 = vmatprep.subr.bf16.mxu0 %v2720_v0 }
 0x1aa   :  { %2121 = vmatpush3.bf16.msra.mxu0 %v2821_v8 }
 0x1ab   :  { %2122 = vmatprep.subr.bf16.mxu0 %v2720_v0 }
 0x1ae   :  { %2123 = vmatpush3.bf16.msra.mxu0 %v2830_v9 }
 0x1af   :  { %2124 = vmatprep.subr.bf16.mxu0 %v2720_v0 }
 0x1b2   :  { %2125 = vmatpush3.bf16.msra.mxu0 %v2837_v10 }
 0x1b3   :  { %2126 = vmatprep.subr.bf16.mxu0 %v2720_v0 }
 0x1b6   :  { %2127 = vmatpush3.bf16.msra.mxu0 %v2844_v11 }
 0x1b7   :  { %2128 = vmatprep.subr.bf16.mxu0 %v2720_v0 }
 0x1ba   :  { %2129 = vmatpush3.bf16.msra.mxu0 %v2851_v12 }
 0x1bb   :  { %2154 = vmatprep.subr.bf16.mxu0 %v2720_v0 }
 0x1bd   :  { %2131 = vmatmul.mubr.bf16.vlgmr.msra.gmra.mrb[12].mxu0 %v296_v57 }
 0x1be   :  { %2155 = vmatpush3.bf16.msra.mxu0 %v2867_v15  ;;  %2170 = vmatprep.mubr.msk.bf16.mxu0 %vm2721_vm0, %v2720_v0 }
 0x1bf   :  { %2156 = vmatprep.subr.bf16.mxu0 %v2720_v0 }
 0x1c2   :  { %2157 = vmatpush3.bf16.msra.mxu0 %v2880_v17 }
 0x1c3   :  { %2158 = vmatprep.subr.bf16.mxu0 %v2720_v0 }
 0x1c6   :  { %2159 = vmatpush3.bf16.msra.mxu0 %v2921_v33 }
 0x1c7   :  { %2160 = vmatprep.subr.bf16.mxu0 %v2720_v0 }
 0x1ca   :  { %2161 = vmatpush3.bf16.msra.mxu0 %v2933_v37 }
 0x1cb   :  { %2162 = vmatprep.subr.bf16.mxu0 %v2720_v0 }
 0x1ce   :  { %2163 = vmatpush3.bf16.msra.mxu0 %v2947_v39 }
 0x1cf   :  { %2164 = vmatprep.subr.bf16.mxu0 %v2720_v0 }
 0x1d2   :  { %2165 = vmatpush3.bf16.msra.mxu0 %v2967_v43 }
 0x1d3   :  { %2166 = vmatprep.subr.bf16.mxu0 %v2720_v0 }
 0x1d6   :  { %2167 = vmatpush3.bf16.msra.mxu0 %v2984_v46 }
 0x1d7   :  { %2168 = vmatprep.subr.bf16.mxu0 %v2720_v0 }
 0x1da   :  { %2169 = vmatpush3.bf16.msra.mxu0 %v3001_v48 }
 0x1db   :  { %2194 = vmatprep.subr.bf16.mxu0 %v2720_v0 }
 0x270   :  { %v402_v20 = vpop.f32.mrb[8].mxu0 }
 0x271   :  { %v403_v25 = vadd.f32 %v3084_v7, %v402_v20  ;;  %v2092_v26 = vpop.f32.mrb[9].mxu0 }
 0x272   :  { %v405_v27 = vpop.f32.mrb[10].mxu0 }
 0x273   :  { %v519_v28 = vadd.f32 %v514_v13, %v403_v25  ;;  %v2093_v29 = vpop.f32.mrb[11].mxu0 }
 0x275   :  { %v1790_v30 = vmul.f32 -1.442695, %v519_v28 }
 0x277   :  { %2602 = vpow2.f32 %v1790_v30 }
 0x281   :  { %v2603_v31 = vpop.eup %2602 }
 0x282   :  { %v523_v32 = vadd.f32 1.0, %v2603_v31 }
 0x284   :  { %2604 = vrcp.f32 %v523_v32 }
 0x28e   :  { %v2605_v34 = vpop.eup %2604 }
 0x28f   :  { %526 = vrot.lane.b32.xlu0 %v2605_v34, %s2723_s30 }
 0x290   :  { %v571_v35 = vpop.f32.mrb[12].mxu0 }
 0x291   :  { %v572_v42 = vadd.f32 %v2908_v24, %v571_v35  ;;  %v2132_v44 = vpop.f32.mrb[13].mxu0 }
 0x292   :  { %v574_v49 = vpop.f32.mrb[14].mxu0 }
 0x293   :  { %v577_v50 = vadd.f32 %v572_v42, %v132_v40  ;;  %v2133_v51 = vpop.f32.mrb[15].mxu0 }
 0x295   :  { %v1791_v52 = vmul.f32 -1.442695, %v577_v50 }
 0x297   :  { %2606 = vpow2.f32 %v1791_v52 }
 0x2a1   :  { %v2607_v53 = vpop.eup %2606 }
 0x2a2   :  { %v581_v54 = vadd.f32 1.0, %v2607_v53 }
 0x2a4   :  { %2608 = vrcp.f32 %v581_v54 }
 0x2ae   :  { %v2609_v55 = vpop.eup %2608 }
 0x2af   :  { %584 = vrot.lane.b32.xlu1 %v2609_v55, %s2723_s30 }
 0x2b3   :  { %589 = vrot.lane.b32.xlu1 %v2609_v55, %s2724_s15 }
 0x2b7   :  { %531 = vrot.lane.b32.xlu1 %v2605_v34, %s2724_s15 }
 0x301   :  { %v527_v57 = vpop.permute.xlu0 %526 }
 0x302   :  { %v528_v22 = vmul.f32 %v527_v57, %v514_v13 }
 0x304   :  { %v529_v62 = vadd.f32 %v528_v22, %v403_v25  ;;  %v137_v22 = vadd.f32 %v2894_v19, %v2903_v23 }
 0x306   :  { %2610 = vtanh.f32 %v529_v62 }
 0x310   :  { %v2611_v20 = vpop.eup %2610 }
 0x311   :  { %v533_v27 = vsub.f32 0.0, %v2611_v20 }
 0x321   :  { %v585_v63 = vpop.permute.xlu1 %584 }
 0x322   :  { %v586_v4 = vmul.f32 %v585_v63, %v572_v42 }
 0x324   :  { %v587_v5 = vadd.f32 %v586_v4, %v132_v40 }
 0x325   :  { %v590_v26 = vpop.permute.xlu1 %589 }
 0x326   :  { %2612 = vtanh.f32 %v587_v5 }
 0x329   :  { %v532_v28 = vpop.permute.xlu1 %531 }
 0x32a   :  { %v534_v29 = vmul.f32 %v533_v27, %v532_v28 }
 0x32c   :  { %v3095_v30 = vadd.f32 %v2611_v20, %v534_v29 }
 0x32e   :  { %v635_v31 = vpack.c.bf16 %v3095_v30, %v3095_v30 }
 0x330   :  { %v2613_v32 = vpop.eup %2612  ;;  %2171 = vmatmul.mubr.bf16.vlgmr.msra.gmra.mrb[16].mxu0 %v635_v31 }
 0x331   :  { %v591_v13 = vsub.f32 %v3028_v56, %v2613_v32  ;;  %2195 = vmatpush3.bf16.msra.mxu0 %v2862_v14  ;;  %2210 = vmatprep.mubr.msk.bf16.mxu0 %vm2721_vm0, %v2720_v0 }
 0x332   :  { %2196 = vmatprep.subr.bf16.mxu0 %v2720_v0 }
 0x333   :  { %v592_v25 = vmul.f32 %v591_v13, %v590_v26 }
 0x335   :  { %v3104_v34 = vadd.f32 %v2613_v32, %v592_v25  ;;  %2197 = vmatpush3.bf16.msra.mxu0 %v2873_v16 }
 0x336   :  { %2198 = vmatprep.subr.bf16.mxu0 %v2720_v0 }
 0x337   :  { %v594_v35 = vpack.c.bf16 %v3104_v34, %v3104_v34 }
 0x339   :  { %2151 = vmatmul.mubr.bf16.vlgmr.msra.gmra.mrb[8].mxu1 %v594_v35  ;;  %2199 = vmatpush3.bf16.msra.mxu0 %v2886_v18 }
 0x33a   :  { %2175 = vmatpush3.bf16.msra.mxu1 %v2789_v1  ;;  %2190 = vmatprep.mubr.msk.bf16.mxu1 %vm2721_vm0, %v2720_v0 }
 0x33b   :  { %2176 = vmatprep.subr.bf16.mxu1 %v2720_v0  ;;  %2200 = vmatprep.subr.bf16.mxu0 %v2720_v0 }
 0x33d   :  { %2201 = vmatpush3.bf16.msra.mxu0 %v2927_v36 }
 0x33e   :  { %2177 = vmatpush3.bf16.msra.mxu1 %v2797_v2  ;;  %2202 = vmatprep.subr.bf16.mxu0 %v2720_v0 }
 0x33f   :  { %2178 = vmatprep.subr.bf16.mxu1 %v2720_v0 }
 0x341   :  { %2203 = vmatpush3.bf16.msra.mxu0 %v2941_v38 }
 0x342   :  { %2179 = vmatpush3.bf16.msra.mxu1 %v2803_v3  ;;  %2204 = vmatprep.subr.bf16.mxu0 %v2720_v0 }
 0x343   :  { %2180 = vmatprep.subr.bf16.mxu1 %v2720_v0 }
 0x345   :  { %2205 = vmatpush3.bf16.msra.mxu0 %v2958_v41 }
 0x346   :  { %2181 = vmatpush3.bf16.msra.mxu1 %v2821_v8  ;;  %2206 = vmatprep.subr.bf16.mxu0 %v2720_v0 }
 0x347   :  { %2182 = vmatprep.subr.bf16.mxu1 %v2720_v0 }
 0x349   :  { %2207 = vmatpush3.bf16.msra.mxu0 %v2978_v45 }
 0x34a   :  { %2183 = vmatpush3.bf16.msra.mxu1 %v2830_v9  ;;  %2208 = vmatprep.subr.bf16.mxu0 %v2720_v0 }
 0x34b   :  { %2184 = vmatprep.subr.bf16.mxu1 %v2720_v0 }
 0x34d   :  { %2209 = vmatpush3.bf16.msra.mxu0 %v2995_v47 }
 0x34e   :  { %2185 = vmatpush3.bf16.msra.mxu1 %v2837_v10  ;;  %2234 = vmatprep.subr.bf16.mxu0 %v2720_v0 }
 0x34f   :  { %2186 = vmatprep.subr.bf16.mxu1 %v2720_v0 }
 0x352   :  { %2187 = vmatpush3.bf16.msra.mxu1 %v2844_v11 }
 0x353   :  { %2188 = vmatprep.subr.bf16.mxu1 %v2720_v0 }
 0x356   :  { %2189 = vmatpush3.bf16.msra.mxu1 %v2851_v12 }
 0x357   :  { %2214 = vmatprep.subr.bf16.mxu1 %v2720_v0 }
 0x359   :  { %2191 = vmatmul.mubr.bf16.vlgmr.msra.gmra.mrb[12].mxu1 %v594_v35 }
 0x35a   :  { %2215 = vmatpush3.bf16.msra.mxu1 %v2867_v15  ;;  %2230 = vmatprep.mubr.msk.bf16.mxu1 %vm2721_vm0, %v2720_v0 }
 0x35b   :  { %2216 = vmatprep.subr.bf16.mxu1 %v2720_v0 }
 0x35e   :  { %2217 = vmatpush3.bf16.msra.mxu1 %v2880_v17 }
 0x35f   :  { %2218 = vmatprep.subr.bf16.mxu1 %v2720_v0 }
 0x362   :  { %2219 = vmatpush3.bf16.msra.mxu1 %v2921_v33 }
 0x363   :  { %2220 = vmatprep.subr.bf16.mxu1 %v2720_v0 }
 0x366   :  { %2221 = vmatpush3.bf16.msra.mxu1 %v2933_v37 }
 0x367   :  { %2222 = vmatprep.subr.bf16.mxu1 %v2720_v0 }
 0x36a   :  { %2223 = vmatpush3.bf16.msra.mxu1 %v2947_v39 }
 0x36b   :  { %2224 = vmatprep.subr.bf16.mxu1 %v2720_v0 }
 0x36e   :  { %2225 = vmatpush3.bf16.msra.mxu1 %v2967_v43 }
 0x36f   :  { %2226 = vmatprep.subr.bf16.mxu1 %v2720_v0 }
 0x372   :  { %2227 = vmatpush3.bf16.msra.mxu1 %v2984_v46 }
 0x373   :  { %2228 = vmatprep.subr.bf16.mxu1 %v2720_v0 }
 0x376   :  { %2229 = vmatpush3.bf16.msra.mxu1 %v3001_v48 }
 0x377   :  { %2254 = vmatprep.subr.bf16.mxu1 %v2720_v0 }
 0x403   :  { %v670_v56 = vpop.f32.mrb[16].mxu0 }
 0x404   :  { %v2172_v40 = vpop.f32.mrb[17].mxu0  ;;  %v671_v54 = vadd.f32 %v3079_v6, %v670_v56 }
 0x405   :  { %v673_v42 = vpop.f32.mrb[18].mxu0 }
 0x406   :  { %v2173_v44 = vpop.f32.mrb[19].mxu0 }
 0x40c   :  { %v629_v49 = vpop.f32.mrb[8].mxu1 }
 0x40d   :  { %v2152_v50 = vpop.f32.mrb[9].mxu1  ;;  %v630_v53 = vadd.f32 %v3084_v7, %v629_v49 }
 0x40e   :  { %v632_v51 = vpop.f32.mrb[10].mxu1 }
 0x40f   :  { %v2153_v52 = vpop.f32.mrb[11].mxu1  ;;  %v676_v55 = vadd.f32 %v671_v54, %v630_v53 }
 0x411   :  { %v1792_v4 = vmul.f32 -1.442695, %v676_v55 }
 0x413   :  { %2614 = vpow2.f32 %v1792_v4 }
 0x41d   :  { %v2615_v28 = vpop.eup %2614 }
 0x41e   :  { %v680_v32 = vadd.f32 1.0, %v2615_v28 }
 0x42c   :  { %v728_v57 = vpop.f32.mrb[12].mxu1 }
 0x42d   :  { %v729_v62 = vadd.f32 %v2908_v24, %v728_v57  ;;  %v2192_v63 = vpop.f32.mrb[13].mxu1 }
 0x42e   :  { %v731_v5 = vpop.f32.mrb[14].mxu1 }
 0x42f   :  { %v734_v20 = vadd.f32 %v729_v62, %v137_v22  ;;  %v2193_v26 = vpop.f32.mrb[15].mxu1 }
 0x431   :  { %v1793_v27 = vmul.f32 -1.442695, %v734_v20 }
 0x433   :  { %2616 = vpow2.f32 %v1793_v27 }
 0x43d   :  { %v2617_v29 = vpop.eup %2616 }
 0x43e   :  { %v738_v31 = vadd.f32 1.0, %v2617_v29 }
 0x440   :  { %2618 = vrcp.f32 %v738_v31 }
 0x441   :  { %2620 = vrcp.f32 %v680_v32  ;;  %v140_v32 = vadd.f32 %v2896_v21, %v2903_v23 }
 0x44a   :  { %v2619_v13 = vpop.eup %2618 }
 0x44b   :  { %746 = vrot.lane.b32.xlu1 %v2619_v13, %s2724_s15  ;;  %741 = vrot.lane.b32.xlu0 %v2619_v13, %s2723_s30  ;;  %v2621_v19 = vpop.eup %2620 }
 0x44f   :  { %688 = vrot.lane.b32.xlu1 %v2621_v19, %s2724_s15  ;;  %683 = vrot.lane.b32.xlu0 %v2621_v19, %s2723_s30 }
 0x4bd   :  { %v742_v25 = vpop.permute.xlu0 %741  ;;  %v747_v50 = vpop.permute.xlu1 %746 }
 0x4be   :  { %v743_v35 = vmul.f32 %v742_v25, %v729_v62 }
 0x4c0   :  { %v744_v56 = vadd.f32 %v743_v35, %v137_v22 }
 0x4c1   :  { %v684_v40 = vpop.permute.xlu0 %683  ;;  %v689_v4 = vpop.permute.xlu1 %688 }
 0x4c2   :  { %2622 = vtanh.f32 %v744_v56  ;;  %v685_v42 = vmul.f32 %v684_v40, %v671_v54 }
 0x4c4   :  { %v686_v44 = vadd.f32 %v685_v42, %v630_v53 }
 0x4c6   :  { %2624 = vtanh.f32 %v686_v44 }
 0x4cc   :  { %v2623_v49 = vpop.eup %2622 }
 0x4cd   :  { %v748_v51 = vsub.f32 %v3104_v34, %v2623_v49 }
 0x4cf   :  { %v749_v52 = vmul.f32 %v748_v51, %v747_v50 }
 0x4d0   :  { %v2625_v55 = vpop.eup %2624 }
 0x4d1   :  { %v3168_v57 = vadd.f32 %v2623_v49, %v749_v52  ;;  %v690_v63 = vsub.f32 %v3095_v30, %v2625_v55 }
 0x4d3   :  { %v751_v62 = vpack.c.bf16 %v3168_v57, %v3168_v57  ;;  %v691_v22 = vmul.f32 %v690_v63, %v689_v4 }
 0x4d5   :  { %2211 = vmatmul.mubr.bf16.vlgmr.msra.gmra.mrb[20].mxu0 %v751_v62  ;;  %v3173_v5 = vadd.f32 %v2625_v55, %v691_v22 }
 0x4d6   :  { %2235 = vmatpush3.bf16.msra.mxu0 %v2789_v1  ;;  %2250 = vmatprep.mubr.msk.bf16.mxu0 %vm2721_vm0, %v2720_v0 }
 0x4d7   :  { %2236 = vmatprep.subr.bf16.mxu0 %v2720_v0  ;;  %v792_v34 = vpack.c.bf16 %v3173_v5, %v3173_v5 }
 0x4d9   :  { %2231 = vmatmul.mubr.bf16.vlgmr.msra.gmra.mrb[16].mxu1 %v792_v34 }
 0x4da   :  { %2237 = vmatpush3.bf16.msra.mxu0 %v2797_v2  ;;  %2255 = vmatpush3.bf16.msra.mxu1 %v2862_v14 }
 0x4db   :  { %2238 = vmatprep.subr.bf16.mxu0 %v2720_v0  ;;  %2256 = vmatprep.subr.bf16.mxu1 %v2720_v0 }
 0x4dc   :  { %2270 = vmatprep.mubr.msk.bf16.mxu1 %vm2721_vm0, %v2720_v0 }
 0x4de   :  { %2239 = vmatpush3.bf16.msra.mxu0 %v2803_v3  ;;  %2257 = vmatpush3.bf16.msra.mxu1 %v2873_v16 }
 0x4df   :  { %2240 = vmatprep.subr.bf16.mxu0 %v2720_v0  ;;  %2258 = vmatprep.subr.bf16.mxu1 %v2720_v0 }
 0x4e2   :  { %2241 = vmatpush3.bf16.msra.mxu0 %v2821_v8  ;;  %2259 = vmatpush3.bf16.msra.mxu1 %v2886_v18 }
 0x4e3   :  { %2242 = vmatprep.subr.bf16.mxu0 %v2720_v0  ;;  %2260 = vmatprep.subr.bf16.mxu1 %v2720_v0 }
 0x4e6   :  { %2243 = vmatpush3.bf16.msra.mxu0 %v2830_v9  ;;  %2261 = vmatpush3.bf16.msra.mxu1 %v2927_v36 }
 0x4e7   :  { %2244 = vmatprep.subr.bf16.mxu0 %v2720_v0  ;;  %2262 = vmatprep.subr.bf16.mxu1 %v2720_v0 }
 0x4ea   :  { %2245 = vmatpush3.bf16.msra.mxu0 %v2837_v10  ;;  %2263 = vmatpush3.bf16.msra.mxu1 %v2941_v38 }
 0x4eb   :  { %2246 = vmatprep.subr.bf16.mxu0 %v2720_v0  ;;  %2264 = vmatprep.subr.bf16.mxu1 %v2720_v0 }
 0x4ee   :  { %2247 = vmatpush3.bf16.msra.mxu0 %v2844_v11  ;;  %2265 = vmatpush3.bf16.msra.mxu1 %v2958_v41 }
 0x4ef   :  { %2248 = vmatprep.subr.bf16.mxu0 %v2720_v0  ;;  %2266 = vmatprep.subr.bf16.mxu1 %v2720_v0 }
 0x4f2   :  { %2249 = vmatpush3.bf16.msra.mxu0 %v2851_v12  ;;  %2267 = vmatpush3.bf16.msra.mxu1 %v2978_v45 }
 0x4f3   :  { %2274 = vmatprep.subr.bf16.mxu0 %v2720_v0  ;;  %2268 = vmatprep.subr.bf16.mxu1 %v2720_v0 }
 0x4f5   :  { %2251 = vmatmul.mubr.bf16.vlgmr.msra.gmra.mrb[24].mxu0 %v751_v62 }
 0x4f6   :  { %2275 = vmatpush3.bf16.msra.mxu0 %v2867_v15  ;;  %2269 = vmatpush3.bf16.msra.mxu1 %v2995_v47 }
 0x4f7   :  { %2276 = vmatprep.subr.bf16.mxu0 %v2720_v0  ;;  %2294 = vmatprep.subr.bf16.mxu1 %v2720_v0 }
 0x4f8   :  { %2290 = vmatprep.mubr.msk.bf16.mxu0 %vm2721_vm0, %v2720_v0 }
 0x4fa   :  { %2277 = vmatpush3.bf16.msra.mxu0 %v2880_v17 }
 0x4fb   :  { %2278 = vmatprep.subr.bf16.mxu0 %v2720_v0 }
 0x4fe   :  { %2279 = vmatpush3.bf16.msra.mxu0 %v2921_v33 }
 0x4ff   :  { %2280 = vmatprep.subr.bf16.mxu0 %v2720_v0 }
 0x502   :  { %2281 = vmatpush3.bf16.msra.mxu0 %v2933_v37 }
 0x503   :  { %2282 = vmatprep.subr.bf16.mxu0 %v2720_v0 }
 0x506   :  { %2283 = vmatpush3.bf16.msra.mxu0 %v2947_v39 }
 0x507   :  { %2284 = vmatprep.subr.bf16.mxu0 %v2720_v0 }
 0x50a   :  { %2285 = vmatpush3.bf16.msra.mxu0 %v2967_v43 }
 0x50b   :  { %2286 = vmatprep.subr.bf16.mxu0 %v2720_v0 }
 0x50e   :  { %2287 = vmatpush3.bf16.msra.mxu0 %v2984_v46 }
 0x50f   :  { %2288 = vmatprep.subr.bf16.mxu0 %v2720_v0 }
 0x512   :  { %2289 = vmatpush3.bf16.msra.mxu0 %v3001_v48 }
 0x513   :  { %2314 = vmatprep.subr.bf16.mxu0 %v2720_v0 }
 0x5a8   :  { %v786_v1 = vpop.f32.mrb[20].mxu0 }
 0x5a9   :  { %v2212_v2 = vpop.f32.mrb[21].mxu0  ;;  %v787_v28 = vadd.f32 %v3084_v7, %v786_v1 }
 0x5aa   :  { %v789_v3 = vpop.f32.mrb[22].mxu0 }
 0x5ab   :  { %v2213_v30 = vpop.f32.mrb[23].mxu0 }
 0x5ac   :  { %v827_v53 = vpop.f32.mrb[16].mxu1 }
 0x5ad   :  { %v2232_v54 = vpop.f32.mrb[17].mxu1  ;;  %v828_v27 = vadd.f32 %v3079_v6, %v827_v53 }
 0x5ae   :  { %v830_v20 = vpop.f32.mrb[18].mxu1 }
 0x5af   :  { %v2233_v26 = vpop.f32.mrb[19].mxu1  ;;  %v833_v29 = vadd.f32 %v828_v27, %v787_v28 }
 0x5b1   :  { %v1794_v25 = vmul.f32 -1.442695, %v833_v29 }
 0x5b3   :  { %2626 = vpow2.f32 %v1794_v25 }
 0x5bd   :  { %v2627_v44 = vpop.eup %2626 }
 0x5be   :  { %v837_v51 = vadd.f32 1.0, %v2627_v44 }
 0x5c8   :  { %v885_v31 = vpop.f32.mrb[24].mxu0 }
 0x5c9   :  { %v886_v13 = vadd.f32 %v2908_v24, %v885_v31  ;;  %v2252_v19 = vpop.f32.mrb[25].mxu0 }
 0x5ca   :  { %v888_v35 = vpop.f32.mrb[26].mxu0 }
 0x5cb   :  { %v891_v56 = vadd.f32 %v886_v13, %v140_v32  ;;  %v2253_v40 = vpop.f32.mrb[27].mxu0 }
 0x5cd   :  { %v1795_v42 = vmul.f32 -1.442695, %v891_v56 }
 0x5cf   :  { %2628 = vpow2.f32 %v1795_v42 }
 0x5d9   :  { %v2629_v49 = vpop.eup %2628 }
 0x5da   :  { %v895_v50 = vadd.f32 1.0, %v2629_v49 }
 0x5dc   :  { %2630 = vrcp.f32 %v895_v50 }
 0x5dd   :  { %2632 = vrcp.f32 %v837_v51 }
 0x5e6   :  { %v2631_v52 = vpop.eup %2630 }
 0x5e7   :  { %903 = vrot.lane.b32.xlu1 %v2631_v52, %s2724_s15  ;;  %898 = vrot.lane.b32.xlu0 %v2631_v52, %s2723_s30  ;;  %v2633_v21 = vpop.eup %2632 }
 0x5eb   :  { %845 = vrot.lane.b32.xlu1 %v2633_v21, %s2724_s15  ;;  %840 = vrot.lane.b32.xlu0 %v2633_v21, %s2723_s30 }
 0x659   :  { %v899_v55 = vpop.permute.xlu0 %898  ;;  %v904_v2 = vpop.permute.xlu1 %903 }
 0x65a   :  { %v900_v63 = vmul.f32 %v899_v55, %v886_v13 }
 0x65c   :  { %v901_v4 = vadd.f32 %v900_v63, %v140_v32 }
 0x65d   :  { %v841_v62 = vpop.permute.xlu0 %840  ;;  %v846_v26 = vpop.permute.xlu1 %845 }
 0x65e   :  { %2634 = vtanh.f32 %v901_v4  ;;  %v842_v22 = vmul.f32 %v841_v62, %v828_v27  ;;  %v3251_v27 = vld [vmem:[%s3721_s2] sm:$0xff]  }
 0x660   :  { %v843_v34 = vadd.f32 %v842_v22, %v787_v28  ;;  %v3273_v28 = vld [vmem:[%s3721_s2 + $0x10] sm:$0xff]  }
 0x662   :  { %2636 = vtanh.f32 %v843_v34 }
 0x668   :  { %v2635_v1 = vpop.eup %2634 }
 0x669   :  { %v905_v3 = vsub.f32 %v3168_v57, %v2635_v1 }
 0x66b   :  { %v906_v30 = vmul.f32 %v905_v3, %v904_v2 }
 0x66c   :  { %v2637_v53 = vpop.eup %2636 }
 0x66d   :  { %v3241_v54 = vadd.f32 %v2635_v1, %v906_v30  ;;  %v847_v20 = vsub.f32 %v3173_v5, %v2637_v53  ;;  %v3262_v5 = vld [vmem:[%s3721_s2 + $0x8] sm:$0xff]  }
 0x66f   :  { %v908_v29 = vpack.c.bf16 %v3241_v54, %v3241_v54  ;;  %v848_v31 = vmul.f32 %v847_v20, %v846_v26  ;;  %v3346_v26 = vld [vmem:[%s3724_s5] sm:$0xff]  }
 0x671   :  { %2271 = vmatmul.mubr.bf16.vlgmr.msra.gmra.mrb[20].mxu1 %v908_v29  ;;  %v3246_v32 = vadd.f32 %v2637_v53, %v848_v31  ;;  %v3365_v31 = vld [vmem:[%s3721_s2 + $0x18] sm:$0xff]  }
 0x672   :  { %2295 = vmatpush3.bf16.msra.mxu1 %v3251_v27  ;;  %2310 = vmatprep.mubr.msk.bf16.mxu1 %vm2721_vm0, %v2720_v0 }
 0x673   :  { %2296 = vmatprep.subr.bf16.mxu1 %v2720_v0  ;;  %v949_v57 = vpack.c.bf16 %v3246_v32, %v3246_v32 }
 0x675   :  { %2291 = vmatmul.mubr.bf16.vlgmr.msra.gmra.mrb[28].mxu0 %v949_v57  ;;  %v3379_v57 = vld [vmem:[%s3721_s2 + $0x20] sm:$0xff]  }
 0x676   :  { %2297 = vmatpush3.bf16.msra.mxu1 %v3262_v5  ;;  %2315 = vmatpush3.bf16.msra.mxu0 %v2862_v14 }
 0x677   :  { %2298 = vmatprep.subr.bf16.mxu1 %v2720_v0  ;;  %2316 = vmatprep.subr.bf16.mxu0 %v2720_v0 }
 0x678   :  { %2330 = vmatprep.mubr.msk.bf16.mxu0 %vm2721_vm0, %v2720_v0 }
 0x67a   :  { %2299 = vmatpush3.bf16.msra.mxu1 %v3273_v28  ;;  %2317 = vmatpush3.bf16.msra.mxu0 %v2873_v16 }
 0x67b   :  { %2300 = vmatprep.subr.bf16.mxu1 %v2720_v0  ;;  %2318 = vmatprep.subr.bf16.mxu0 %v2720_v0 }
 0x67e   :  { %2301 = vmatpush3.bf16.msra.mxu1 %v2821_v8  ;;  %2319 = vmatpush3.bf16.msra.mxu0 %v2886_v18 }
 0x67f   :  { %2302 = vmatprep.subr.bf16.mxu1 %v2720_v0  ;;  %2320 = vmatprep.subr.bf16.mxu0 %v2720_v0 }
 0x682   :  { %2303 = vmatpush3.bf16.msra.mxu1 %v2830_v9  ;;  %2321 = vmatpush3.bf16.msra.mxu0 %v2927_v36 }
 0x683   :  { %2304 = vmatprep.subr.bf16.mxu1 %v2720_v0  ;;  %2322 = vmatprep.subr.bf16.mxu0 %v2720_v0 }
 0x686   :  { %2305 = vmatpush3.bf16.msra.mxu1 %v2837_v10  ;;  %2323 = vmatpush3.bf16.msra.mxu0 %v2941_v38 }
 0x687   :  { %2306 = vmatprep.subr.bf16.mxu1 %v2720_v0  ;;  %2324 = vmatprep.subr.bf16.mxu0 %v2720_v0 }
 0x68a   :  { %2307 = vmatpush3.bf16.msra.mxu1 %v2844_v11  ;;  %2325 = vmatpush3.bf16.msra.mxu0 %v2958_v41 }
 0x68b   :  { %2308 = vmatprep.subr.bf16.mxu1 %v2720_v0  ;;  %2326 = vmatprep.subr.bf16.mxu0 %v2720_v0 }
 0x68e   :  { %2309 = vmatpush3.bf16.msra.mxu1 %v2851_v12  ;;  %2327 = vmatpush3.bf16.msra.mxu0 %v2978_v45 }
 0x68f   :  { %2334 = vmatprep.subr.bf16.mxu1 %v2720_v0  ;;  %2328 = vmatprep.subr.bf16.mxu0 %v2720_v0 }
 0x691   :  { %2311 = vmatmul.mubr.bf16.vlgmr.msra.gmra.mrb[24].mxu1 %v908_v29  ;;  %v3357_v29 = vld [vmem:[%s3724_s5 + $0x8] sm:$0xff]  }
 0x692   :  { %2335 = vmatpush3.bf16.msra.mxu1 %v2867_v15  ;;  %2329 = vmatpush3.bf16.msra.mxu0 %v2995_v47 }
 0x693   :  { %2336 = vmatprep.subr.bf16.mxu1 %v2720_v0  ;;  %2354 = vmatprep.subr.bf16.mxu0 %v2720_v0 }
 0x694   :  { %2350 = vmatprep.mubr.msk.bf16.mxu1 %vm2721_vm0, %v2720_v0 }
 0x696   :  { %2337 = vmatpush3.bf16.msra.mxu1 %v2880_v17 }
 0x697   :  { %2338 = vmatprep.subr.bf16.mxu1 %v2720_v0 }
 0x69a   :  { %2339 = vmatpush3.bf16.msra.mxu1 %v2921_v33 }
 0x69b   :  { %2340 = vmatprep.subr.bf16.mxu1 %v2720_v0 }
 0x69e   :  { %2341 = vmatpush3.bf16.msra.mxu1 %v2933_v37 }
 0x69f   :  { %2342 = vmatprep.subr.bf16.mxu1 %v2720_v0 }
 0x6a2   :  { %2343 = vmatpush3.bf16.msra.mxu1 %v2947_v39  ;;  %v145_v39 = vadd.f32 %v2903_v23, %v3070_v59 }
 0x6a3   :  { %2344 = vmatprep.subr.bf16.mxu1 %v2720_v0 }
 0x6a6   :  { %2345 = vmatpush3.bf16.msra.mxu1 %v2967_v43 }
 0x6a7   :  { %2346 = vmatprep.subr.bf16.mxu1 %v2720_v0 }
 0x6aa   :  { %2347 = vmatpush3.bf16.msra.mxu1 %v2984_v46 }
 0x6ab   :  { %2348 = vmatprep.subr.bf16.mxu1 %v2720_v0 }
 0x6ae   :  { %2349 = vmatpush3.bf16.msra.mxu1 %v3001_v48 }
 0x6af   :  { %2374 = vmatprep.subr.bf16.mxu1 %v2720_v0 }
 0x744   :  { %v943_v8 = vpop.f32.mrb[20].mxu1 }
 0x745   :  { %v2272_v9 = vpop.f32.mrb[21].mxu1  ;;  %v944_v18 = vadd.f32 %v3084_v7, %v943_v8  ;;  %v3388_v8 = vld [vmem:[%s3721_s2 + $0x28] sm:$0xff]  }
 0x746   :  { %v946_v10 = vpop.f32.mrb[22].mxu1  ;;  %v3440_v9 = vld [vmem:[%s3725_s6 + $0x18] sm:$0xff]  }
 0x747   :  { %v2273_v11 = vpop.f32.mrb[23].mxu1  ;;  %v3447_v10 = vld [vmem:[%s3725_s6 + $0x20] sm:$0xff]  }
 0x748   :  { %v984_v12 = vpop.f32.mrb[28].mxu0  ;;  %v3454_v11 = vld [vmem:[%s3725_s6 + $0x28] sm:$0xff]  }
 0x749   :  { %v2292_v14 = vpop.f32.mrb[29].mxu0  ;;  %v985_v17 = vadd.f32 %v3079_v6, %v984_v12  ;;  %v3461_v12 = vld [vmem:[%s3725_s6 + $0x30] sm:$0xff]  }
 0x74a   :  { %v987_v15 = vpop.f32.mrb[30].mxu0 }
 0x74b   :  { %v2293_v16 = vpop.f32.mrb[31].mxu0  ;;  %v990_v33 = vadd.f32 %v985_v17, %v944_v18 }
 0x74d   :  { %v1796_v13 = vmul.f32 -1.442695, %v990_v33 }
 0x74f   :  { %2638 = vpow2.f32 %v1796_v13 }
 0x759   :  { %v2639_v40 = vpop.eup %2638 }
 0x75a   :  { %v994_v49 = vadd.f32 1.0, %v2639_v40 }
 0x764   :  { %v1042_v37 = vpop.f32.mrb[24].mxu1 }
 0x765   :  { %v1043_v43 = vadd.f32 %v2908_v24, %v1042_v37  ;;  %v2312_v46 = vpop.f32.mrb[25].mxu1 }
 0x766   :  { %v1045_v19 = vpop.f32.mrb[26].mxu1 }
 0x767   :  { %v1048_v25 = vadd.f32 %v1043_v43, %v145_v39  ;;  %v2313_v35 = vpop.f32.mrb[27].mxu1 }
 0x768   :  { %v3479_v35 = vld [vmem:[%s3727_s4] ss:$0 sm:$0xff] }
 0x769   :  { %v1797_v56 = vmul.f32 -1.442695, %v1048_v25 }
 0x76b   :  { %2640 = vpow2.f32 %v1797_v56 }
 0x775   :  { %v2641_v42 = vpop.eup %2640 }
 0x776   :  { %v1052_v44 = vadd.f32 1.0, %v2641_v42 }
 0x778   :  { %2642 = vrcp.f32 %v1052_v44 }
 0x779   :  { %2644 = vrcp.f32 %v994_v49 }
 0x782   :  { %v2643_v50 = vpop.eup %2642 }
 0x783   :  { %1060 = vrot.lane.b32.xlu1 %v2643_v50, %s2724_s15  ;;  %1055 = vrot.lane.b32.xlu0 %v2643_v50, %s2723_s30  ;;  %v2645_v23 = vpop.eup %2644 }
 0x787   :  { %1002 = vrot.lane.b32.xlu1 %v2645_v23, %s2724_s15  ;;  %997 = vrot.lane.b32.xlu0 %v2645_v23, %s2723_s30 }
 0x7f5   :  { %v1056_v24 = vpop.permute.xlu0 %1055  ;;  %v1061_v4 = vpop.permute.xlu1 %1060 }
 0x7f6   :  { %v1057_v59 = vmul.f32 %v1056_v24, %v1043_v43 }
 0x7f8   :  { %v1058_v51 = vadd.f32 %v1057_v59, %v145_v39 }
 0x7f9   :  { %v998_v52 = vpop.permute.xlu0 %997  ;;  %v1003_v3 = vpop.permute.xlu1 %1002 }
 0x7fa   :  { %2646 = vtanh.f32 %v1058_v51  ;;  %v999_v21 = vmul.f32 %v998_v52, %v985_v17 }
 0x7fc   :  { %v1000_v55 = vadd.f32 %v999_v21, %v944_v18 }
 0x7fe   :  { %2648 = vtanh.f32 %v1000_v55 }
 0x804   :  { %v2647_v63 = vpop.eup %2646 }
 0x805   :  { %v1062_v62 = vsub.f32 %v3241_v54, %v2647_v63 }
 0x807   :  { %v1063_v22 = vmul.f32 %v1062_v62, %v1061_v4 }
 0x808   :  { %v2649_v34 = vpop.eup %2648 }
 0x809   :  { %v3329_v1 = vadd.f32 %v2647_v63, %v1063_v22  ;;  %v1004_v2 = vsub.f32 %v3246_v32, %v2649_v34  ;;  %v3371_v32 = vld [vmem:[%s3724_s5 + $0x10] sm:$0xff]  }
 0x80b   :  { %v1065_v30 = vpack.c.bf16 %v3329_v1, %v3329_v1  ;;  %v1005_v53 = vmul.f32 %v1004_v2, %v1003_v3 }
 0x80d   :  { %2331 = vmatmul.mubr.bf16.vlgmr.msra.gmra.mrb[32].mxu0 %v1065_v30  ;;  %v3334_v20 = vadd.f32 %v2649_v34, %v1005_v53 }
 0x80e   :  { %2355 = vmatpush3.bf16.msra.mxu0 %v3251_v27  ;;  %2370 = vmatprep.mubr.msk.bf16.mxu0 %vm2721_vm0, %v2720_v0 }
 0x80f   :  { %2356 = vmatprep.subr.bf16.mxu0 %v2720_v0  ;;  %v1106_v54 = vpack.c.bf16 %v3334_v20, %v3334_v20 }
 0x811   :  { %2351 = vmatmul.mubr.bf16.vlgmr.msra.gmra.mrb[28].mxu1 %v1106_v54 }
 0x812   :  { %2357 = vmatpush3.bf16.msra.mxu0 %v3262_v5  ;;  %2375 = vmatpush3.bf16.msra.mxu1 %v3346_v26 }
 0x813   :  { %2358 = vmatprep.subr.bf16.mxu0 %v2720_v0  ;;  %2376 = vmatprep.subr.bf16.mxu1 %v2720_v0 }
 0x814   :  { %2390 = vmatprep.mubr.msk.bf16.mxu1 %vm2721_vm0, %v2720_v0 }
 0x816   :  { %2359 = vmatpush3.bf16.msra.mxu0 %v3273_v28  ;;  %2377 = vmatpush3.bf16.msra.mxu1 %v3357_v29 }
 0x817   :  { %2360 = vmatprep.subr.bf16.mxu0 %v2720_v0  ;;  %2378 = vmatprep.subr.bf16.mxu1 %v2720_v0 }
 0x81a   :  { %2361 = vmatpush3.bf16.msra.mxu0 %v3365_v31  ;;  %2379 = vmatpush3.bf16.msra.mxu1 %v3371_v32 }
 0x81b   :  { %2362 = vmatprep.subr.bf16.mxu0 %v2720_v0  ;;  %2380 = vmatprep.subr.bf16.mxu1 %v2720_v0 }
 0x81e   :  { %2363 = vmatpush3.bf16.msra.mxu0 %v3379_v57  ;;  %2381 = vmatpush3.bf16.msra.mxu1 %v2927_v36  ;;  %v3397_v36 = vld [vmem:[%s3721_s2 + $0x30] sm:$0xff]  }
 0x81f   :  { %2364 = vmatprep.subr.bf16.mxu0 %v2720_v0  ;;  %2382 = vmatprep.subr.bf16.mxu1 %v2720_v0 }
 0x822   :  { %2365 = vmatpush3.bf16.msra.mxu0 %v3388_v8  ;;  %2383 = vmatpush3.bf16.msra.mxu1 %v2941_v38  ;;  %v3406_v38 = vld [vmem:[%s3721_s2 + $0x38] sm:$0xff]  }
 0x823   :  { %2366 = vmatprep.subr.bf16.mxu0 %v2720_v0  ;;  %2384 = vmatprep.subr.bf16.mxu1 %v2720_v0 }
 0x826   :  { %2367 = vmatpush3.bf16.msra.mxu0 %v3397_v36  ;;  %2385 = vmatpush3.bf16.msra.mxu1 %v2958_v41  ;;  %v3415_v41 = vld [vmem:[%s3725_s6] sm:$0xff]  }
 0x827   :  { %2368 = vmatprep.subr.bf16.mxu0 %v2720_v0  ;;  %2386 = vmatprep.subr.bf16.mxu1 %v2720_v0 }
 0x82a   :  { %2369 = vmatpush3.bf16.msra.mxu0 %v3406_v38  ;;  %2387 = vmatpush3.bf16.msra.mxu1 %v2978_v45  ;;  %v3426_v45 = vld [vmem:[%s3725_s6 + $0x8] sm:$0xff]  }
 0x82b   :  { %2394 = vmatprep.subr.bf16.mxu0 %v2720_v0  ;;  %2388 = vmatprep.subr.bf16.mxu1 %v2720_v0 }
 0x82d   :  { %2371 = vmatmul.mubr.bf16.vlgmr.msra.gmra.mrb[36].mxu0 %v1065_v30 }
 0x82e   :  { %2395 = vmatpush3.bf16.msra.mxu0 %v3415_v41  ;;  %2389 = vmatpush3.bf16.msra.mxu1 %v2995_v47  ;;  %v3433_v47 = vld [vmem:[%s3725_s6 + $0x10] sm:$0xff]  }
 0x82f   :  { %2396 = vmatprep.subr.bf16.mxu0 %v2720_v0  ;;  %2414 = vmatprep.subr.bf16.mxu1 %v2720_v0 }
 0x830   :  { %2410 = vmatprep.mubr.msk.bf16.mxu0 %vm2721_vm0, %v2720_v0 }
 0x832   :  { %2397 = vmatpush3.bf16.msra.mxu0 %v3426_v45 }
 0x833   :  { %2398 = vmatprep.subr.bf16.mxu0 %v2720_v0 }
 0x836   :  { %2399 = vmatpush3.bf16.msra.mxu0 %v3433_v47 }
 0x837   :  { %2400 = vmatprep.subr.bf16.mxu0 %v2720_v0 }
 0x83a   :  { %2401 = vmatpush3.bf16.msra.mxu0 %v3440_v9 }
 0x83b   :  { %2402 = vmatprep.subr.bf16.mxu0 %v2720_v0 }
 0x83e   :  { %2403 = vmatpush3.bf16.msra.mxu0 %v3447_v10 }
 0x83f   :  { %2404 = vmatprep.subr.bf16.mxu0 %v2720_v0 }
 0x842   :  { %2405 = vmatpush3.bf16.msra.mxu0 %v3454_v11 }
 0x843   :  { %2406 = vmatprep.subr.bf16.mxu0 %v2720_v0 }
 0x846   :  { %2407 = vmatpush3.bf16.msra.mxu0 %v3461_v12 }
 0x847   :  { %2408 = vmatprep.subr.bf16.mxu0 %v2720_v0 }
 0x84a   :  { %2409 = vmatpush3.bf16.msra.mxu0 %v3001_v48  ;;  %v3472_v48 = vld [vmem:[%s3726_s3] ss:$0 sm:$0xff] }
 0x84b   :  { %2434 = vmatprep.subr.bf16.mxu0 %v2720_v0  ;;  %v148_v25 = vadd.f32 %v3472_v48, %v3074_v61 }
 0x8e0   :  { %v1100_v14 = vpop.f32.mrb[32].mxu0 }
 0x8e1   :  { %v2332_v15 = vpop.f32.mrb[33].mxu0  ;;  %v1101_v46 = vadd.f32 %v3084_v7, %v1100_v14 }
 0x8e2   :  { %v1103_v16 = vpop.f32.mrb[34].mxu0 }
 0x8e3   :  { %v2333_v17 = vpop.f32.mrb[35].mxu0 }
 0x8e4   :  { %v1141_v18 = vpop.f32.mrb[28].mxu1 }
 0x8e5   :  { %v2352_v33 = vpop.f32.mrb[29].mxu1  ;;  %v1142_v43 = vadd.f32 %v3079_v6, %v1141_v18  ;;  %v3527_v18 = vld [vmem:[%s3724_s5 + $0x20] sm:$0xff]  }
 0x8e6   :  { %v1144_v37 = vpop.f32.mrb[30].mxu1  ;;  %v3536_v33 = vld [vmem:[%s3724_s5 + $0x28] sm:$0xff]  }
 0x8e7   :  { %v2353_v39 = vpop.f32.mrb[31].mxu1  ;;  %v1147_v13 = vadd.f32 %v1142_v43, %v1101_v46  ;;  %v3545_v37 = vld [vmem:[%s3724_s5 + $0x30] sm:$0xff]  }
 0x8e8   :  { %v3554_v39 = vld [vmem:[%s3724_s5 + $0x38] sm:$0xff]  }
 0x8e9   :  { %v1798_v40 = vmul.f32 -1.442695, %v1147_v13 }
 0x8eb   :  { %2650 = vpow2.f32 %v1798_v40 }
 0x8f5   :  { %v2651_v50 = vpop.eup %2650 }
 0x8f6   :  { %v1151_v59 = vadd.f32 1.0, %v2651_v50 }
 0x900   :  { %v1199_v19 = vpop.f32.mrb[36].mxu0 }
 0x901   :  { %v1200_v56 = vadd.f32 %v3479_v35, %v1199_v19  ;;  %v2372_v6 = vpop.f32.mrb[37].mxu0 }
 0x902   :  { %v1202_v7 = vpop.f32.mrb[38].mxu0 }
 0x903   :  { %v1205_v42 = vadd.f32 %v1200_v56, %v148_v25  ;;  %v2373_v44 = vpop.f32.mrb[39].mxu0 }
 0x905   :  { %v1799_v49 = vmul.f32 -1.442695, %v1205_v42  ;;  %v3583_v42 = vld [vmem:[%s3728_s8] ss:$0 sm:$0xff] }
 0x907   :  { %2652 = vpow2.f32 %v1799_v49  ;;  %v3589_v49 = vld [vmem:[%s3729_s7] ss:$0 sm:$0xff] }
 0x911   :  { %v2653_v23 = vpop.eup %2652 }
 0x912   :  { %v1209_v24 = vadd.f32 1.0, %v2653_v23 }
 0x914   :  { %2654 = vrcp.f32 %v1209_v24 }
 0x915   :  { %2656 = vrcp.f32 %v1151_v59  ;;  %v153_v59 = vadd.f32 %v3472_v48, %v3068_v58 }
 0x91e   :  { %v2655_v61 = vpop.eup %2654 }
 0x91f   :  { %1217 = vrot.lane.b32.xlu1 %v2655_v61, %s2724_s15  ;;  %1212 = vrot.lane.b32.xlu0 %v2655_v61, %s2723_s30  ;;  %v2657_v51 = vpop.eup %2656 }
 0x923   :  { %1159 = vrot.lane.b32.xlu1 %v2657_v51, %s2724_s15  ;;  %1154 = vrot.lane.b32.xlu0 %v2657_v51, %s2723_s30 }
 0x991   :  { %v1213_v52 = vpop.permute.xlu0 %1212  ;;  %v1218_v34 = vpop.permute.xlu1 %1217 }
 0x992   :  { %v1214_v21 = vmul.f32 %v1213_v52, %v1200_v56 }
 0x994   :  { %v1215_v55 = vadd.f32 %v1214_v21, %v148_v25 }
 0x995   :  { %v1155_v63 = vpop.permute.xlu0 %1154  ;;  %v1160_v14 = vpop.permute.xlu1 %1159 }
 0x996   :  { %2658 = vtanh.f32 %v1215_v55  ;;  %v1156_v4 = vmul.f32 %v1155_v63, %v1142_v43  ;;  %v3576_v43 = vld [vmem:[%s3725_s6 + $0x38] sm:$0xff]  }
 0x998   :  { %v1157_v62 = vadd.f32 %v1156_v4, %v1101_v46 }
 0x99a   :  { %2660 = vtanh.f32 %v1157_v62 }
 0x9a0   :  { %v2659_v22 = vpop.eup %2658 }
 0x9a1   :  { %v1219_v2 = vsub.f32 %v3329_v1, %v2659_v22 }
 0x9a3   :  { %v1220_v3 = vmul.f32 %v1219_v2, %v1218_v34 }
 0x9a4   :  { %v2661_v30 = vpop.eup %2660 }
 0x9a5   :  { %v3487_v53 = vadd.f32 %v2659_v22, %v1220_v3  ;;  %v1161_v54 = vsub.f32 %v3334_v20, %v2661_v30  ;;  %v3518_v20 = vld [vmem:[%s3724_s5 + $0x18] sm:$0xff]  }
 0x9a7   :  { %v1222_v15 = vpack.c.bf16 %v3487_v53, %v3487_v53  ;;  %v1162_v16 = vmul.f32 %v1161_v54, %v1160_v14 }
 0x9a9   :  { %2391 = vmatmul.mubr.bf16.vlgmr.msra.gmra.mrb[32].mxu1 %v1222_v15  ;;  %v3492_v17 = vadd.f32 %v2661_v30, %v1162_v16 }
 0x9aa   :  { %2415 = vmatpush3.bf16.msra.mxu1 %v3251_v27  ;;  %2430 = vmatprep.mubr.msk.bf16.mxu1 %vm2721_vm0, %v2720_v0 }
 0x9ab   :  { %2416 = vmatprep.subr.bf16.mxu1 %v2720_v0  ;;  %v1263_v1 = vpack.c.bf16 %v3492_v17, %v3492_v17 }
 0x9ad   :  { %2411 = vmatmul.mubr.bf16.vlgmr.msra.gmra.mrb[40].mxu0 %v1263_v1 }
 0x9ae   :  { %2417 = vmatpush3.bf16.msra.mxu1 %v3262_v5  ;;  %2435 = vmatpush3.bf16.msra.mxu0 %v3346_v26 }
 0x9af   :  { %2418 = vmatprep.subr.bf16.mxu1 %v2720_v0  ;;  %2436 = vmatprep.subr.bf16.mxu0 %v2720_v0 }
 0x9b0   :  { %2450 = vmatprep.mubr.msk.bf16.mxu0 %vm2721_vm0, %v2720_v0 }
 0x9b2   :  { %2419 = vmatpush3.bf16.msra.mxu1 %v3273_v28  ;;  %2437 = vmatpush3.bf16.msra.mxu0 %v3357_v29 }
 0x9b3   :  { %2420 = vmatprep.subr.bf16.mxu1 %v2720_v0  ;;  %2438 = vmatprep.subr.bf16.mxu0 %v2720_v0 }
 0x9b6   :  { %2421 = vmatpush3.bf16.msra.mxu1 %v3365_v31  ;;  %2439 = vmatpush3.bf16.msra.mxu0 %v3371_v32 }
 0x9b7   :  { %2422 = vmatprep.subr.bf16.mxu1 %v2720_v0  ;;  %2440 = vmatprep.subr.bf16.mxu0 %v2720_v0 }
 0x9ba   :  { %2423 = vmatpush3.bf16.msra.mxu1 %v3379_v57  ;;  %2441 = vmatpush3.bf16.msra.mxu0 %v3518_v20 }
 0x9bb   :  { %2424 = vmatprep.subr.bf16.mxu1 %v2720_v0  ;;  %2442 = vmatprep.subr.bf16.mxu0 %v2720_v0 }
 0x9be   :  { %2425 = vmatpush3.bf16.msra.mxu1 %v3388_v8  ;;  %2443 = vmatpush3.bf16.msra.mxu0 %v3527_v18 }
 0x9bf   :  { %2426 = vmatprep.subr.bf16.mxu1 %v2720_v0  ;;  %2444 = vmatprep.subr.bf16.mxu0 %v2720_v0 }
 0x9c2   :  { %2427 = vmatpush3.bf16.msra.mxu1 %v3397_v36  ;;  %2445 = vmatpush3.bf16.msra.mxu0 %v3536_v33 }
 0x9c3   :  { %2428 = vmatprep.subr.bf16.mxu1 %v2720_v0  ;;  %2446 = vmatprep.subr.bf16.mxu0 %v2720_v0 }
 0x9c6   :  { %2429 = vmatpush3.bf16.msra.mxu1 %v3406_v38  ;;  %2447 = vmatpush3.bf16.msra.mxu0 %v3545_v37 }
 0x9c7   :  { %2454 = vmatprep.subr.bf16.mxu1 %v2720_v0  ;;  %2448 = vmatprep.subr.bf16.mxu0 %v2720_v0 }
 0x9c9   :  { %2431 = vmatmul.mubr.bf16.vlgmr.msra.gmra.mrb[36].mxu1 %v1222_v15 }
 0x9ca   :  { %2455 = vmatpush3.bf16.msra.mxu1 %v3415_v41  ;;  %2449 = vmatpush3.bf16.msra.mxu0 %v3554_v39 }
 0x9cb   :  { %2456 = vmatprep.subr.bf16.mxu1 %v2720_v0  ;;  %2474 = vmatprep.subr.bf16.mxu0 %v2720_v0 }
 0x9cc   :  { %2470 = vmatprep.mubr.msk.bf16.mxu1 %vm2721_vm0, %v2720_v0 }
 0x9ce   :  { %2457 = vmatpush3.bf16.msra.mxu1 %v3426_v45 }
 0x9cf   :  { %2458 = vmatprep.subr.bf16.mxu1 %v2720_v0 }
 0x9d2   :  { %2459 = vmatpush3.bf16.msra.mxu1 %v3433_v47 }
 0x9d3   :  { %2460 = vmatprep.subr.bf16.mxu1 %v2720_v0 }
 0x9d6   :  { %2461 = vmatpush3.bf16.msra.mxu1 %v3440_v9 }
 0x9d7   :  { %2462 = vmatprep.subr.bf16.mxu1 %v2720_v0 }
 0x9da   :  { %2463 = vmatpush3.bf16.msra.mxu1 %v3447_v10 }
 0x9db   :  { %2464 = vmatprep.subr.bf16.mxu1 %v2720_v0 }
 0x9de   :  { %2465 = vmatpush3.bf16.msra.mxu1 %v3454_v11 }
 0x9df   :  { %2466 = vmatprep.subr.bf16.mxu1 %v2720_v0 }
 0x9e2   :  { %2467 = vmatpush3.bf16.msra.mxu1 %v3461_v12 }
 0x9e3   :  { %2468 = vmatprep.subr.bf16.mxu1 %v2720_v0 }
 0x9e6   :  { %2469 = vmatpush3.bf16.msra.mxu1 %v3576_v43 }
 0x9e7   :  { %2494 = vmatprep.subr.bf16.mxu1 %v2720_v0 }
 0xa7c   :  { %v1257_v46 = vpop.f32.mrb[32].mxu1 }
 0xa7d   :  { %v2392_v13 = vpop.f32.mrb[33].mxu1  ;;  %v1258_v50 = vadd.f32 %v3589_v49, %v1257_v46 }
 0xa7e   :  { %v1260_v19 = vpop.f32.mrb[34].mxu1 }
 0xa7f   :  { %v2393_v25 = vpop.f32.mrb[35].mxu1 }
 0xa80   :  { %v1298_v56 = vpop.f32.mrb[40].mxu0 }
 0xa81   :  { %v2412_v6 = vpop.f32.mrb[41].mxu0  ;;  %v1299_v44 = vadd.f32 %v3583_v42, %v1298_v56 }
 0xa82   :  { %v1301_v40 = vpop.f32.mrb[42].mxu0 }
 0xa83   :  { %v2413_v7 = vpop.f32.mrb[43].mxu0  ;;  %v1304_v23 = vadd.f32 %v1299_v44, %v1258_v50 }
 0xa85   :  { %v1800_v52 = vmul.f32 -1.442695, %v1304_v23 }
 0xa87   :  { %2662 = vpow2.f32 %v1800_v52 }
 0xa91   :  { %v2663_v62 = vpop.eup %2662 }
 0xa92   :  { %v1308_v2 = vadd.f32 1.0, %v2663_v62 }
 0xa9c   :  { %v1356_v24 = vpop.f32.mrb[36].mxu1 }
 0xa9d   :  { %v1357_v61 = vadd.f32 %v3479_v35, %v1356_v24  ;;  %v2432_v51 = vpop.f32.mrb[37].mxu1 }
 0xa9e   :  { %v1359_v21 = vpop.f32.mrb[38].mxu1 }
 0xa9f   :  { %v1362_v55 = vadd.f32 %v1357_v61, %v153_v59  ;;  %v2433_v63 = vpop.f32.mrb[39].mxu1 }
 0xaa1   :  { %v1801_v4 = vmul.f32 -1.442695, %v1362_v55 }
 0xaa3   :  { %2664 = vpow2.f32 %v1801_v4 }
 0xaad   :  { %v2665_v22 = vpop.eup %2664 }
 0xaae   :  { %v1366_v34 = vadd.f32 1.0, %v2665_v22 }
 0xab0   :  { %2666 = vrcp.f32 %v1366_v34 }
 0xab1   :  { %2668 = vrcp.f32 %v1308_v2 }
 0xaba   :  { %v2667_v3 = vpop.eup %2666 }
 0xabb   :  { %1374 = vrot.lane.b32.xlu1 %v2667_v3, %s2724_s15  ;;  %1369 = vrot.lane.b32.xlu0 %v2667_v3, %s2723_s30  ;;  %v2669_v58 = vpop.eup %2668 }
 0xabf   :  { %1316 = vrot.lane.b32.xlu1 %v2669_v58, %s2724_s15  ;;  %1311 = vrot.lane.b32.xlu0 %v2669_v58, %s2723_s30 }
 0xb2d   :  { %v1370_v30 = vpop.permute.xlu0 %1369  ;;  %v1375_v13 = vpop.permute.xlu1 %1374 }
 0xb2e   :  { %v1371_v54 = vmul.f32 %v1370_v30, %v1357_v61 }
 0xb30   :  { %v1372_v14 = vadd.f32 %v1371_v54, %v153_v59  ;;  %v2588_v54 = vld [vmem:[%s3730_s9] sm:$0xff]  }
 0xb31   :  { %v1312_v15 = vpop.permute.xlu0 %1311  ;;  %v1317_v7 = vpop.permute.xlu1 %1316 }
 0xb32   :  { %2670 = vtanh.f32 %v1372_v14  ;;  %v1313_v16 = vmul.f32 %v1312_v15, %v1299_v44  ;;  %v2589_v14 = vld [vmem:[%s3730_s9 + $0x8] sm:$0xff]  }
 0xb34   :  { %v1314_v1 = vadd.f32 %v1313_v16, %v1258_v50 }
 0xb36   :  { %2672 = vtanh.f32 %v1314_v1 }
 0xb3c   :  { %v2671_v46 = vpop.eup %2670 }
 0xb3d   :  { %v1376_v19 = vsub.f32 %v3487_v53, %v2671_v46 }
 0xb3f   :  { %v1377_v25 = vmul.f32 %v1376_v19, %v1375_v13 }
 0xb40   :  { %v2673_v56 = vpop.eup %2672 }
 0xb41   :  { %v3600_v6 = vadd.f32 %v2671_v46, %v1377_v25  ;;  %v1318_v40 = vsub.f32 %v3492_v17, %v2673_v56 }
 0xb43   :  { %v1379_v23 = vpack.c.bf16 %v3600_v6, %v3600_v6  ;;  %v1319_v24 = vmul.f32 %v1318_v40, %v1317_v7 }
 0xb45   :  { %2451 = vmatmul.mubr.bf16.vlgmr.msra.gmra.mrb[44].mxu0 %v1379_v23  ;;  %v3605_v59 = vadd.f32 %v2673_v56, %v1319_v24  ;;  %v2590_v24 = vld [vmem:[%s3730_s9 + $0x10] sm:$0xff]  }
 0xb46   :  { %2475 = vmatpush3.bf16.msra.mxu0 %v3251_v27  ;;  %2490 = vmatprep.mubr.msk.bf16.mxu0 %vm2721_vm0, %v2720_v0 }
 0xb47   :  { %2476 = vmatprep.subr.bf16.mxu0 %v2720_v0  ;;  %v1420_v53 = vpack.c.bf16 %v3605_v59, %v3605_v59 }
 0xb49   :  { %2471 = vmatmul.mubr.bf16.vlgmr.msra.gmra.mrb[40].mxu1 %v1420_v53 }
 0xb4a   :  { %2477 = vmatpush3.bf16.msra.mxu0 %v3262_v5  ;;  %2495 = vmatpush3.bf16.msra.mxu1 %v3346_v26 }
 0xb4b   :  { %2478 = vmatprep.subr.bf16.mxu0 %v2720_v0  ;;  %2496 = vmatprep.subr.bf16.mxu1 %v2720_v0 }
 0xb4c   :  { %2510 = vmatprep.mubr.msk.bf16.mxu1 %vm2721_vm0, %v2720_v0 }
 0xb4e   :  { %2479 = vmatpush3.bf16.msra.mxu0 %v3273_v28  ;;  %2497 = vmatpush3.bf16.msra.mxu1 %v3357_v29 }
 0xb4f   :  { %2480 = vmatprep.subr.bf16.mxu0 %v2720_v0  ;;  %2498 = vmatprep.subr.bf16.mxu1 %v2720_v0 }
 0xb52   :  { %2481 = vmatpush3.bf16.msra.mxu0 %v3365_v31  ;;  %2499 = vmatpush3.bf16.msra.mxu1 %v3371_v32 }
 0xb53   :  { %2482 = vmatprep.subr.bf16.mxu0 %v2720_v0  ;;  %2500 = vmatprep.subr.bf16.mxu1 %v2720_v0 }
 0xb56   :  { %2483 = vmatpush3.bf16.msra.mxu0 %v3379_v57  ;;  %2501 = vmatpush3.bf16.msra.mxu1 %v3518_v20 }
 0xb57   :  { %2484 = vmatprep.subr.bf16.mxu0 %v2720_v0  ;;  %2502 = vmatprep.subr.bf16.mxu1 %v2720_v0 }
 0xb5a   :  { %2485 = vmatpush3.bf16.msra.mxu0 %v3388_v8  ;;  %2503 = vmatpush3.bf16.msra.mxu1 %v3527_v18 }
 0xb5b   :  { %2486 = vmatprep.subr.bf16.mxu0 %v2720_v0  ;;  %2504 = vmatprep.subr.bf16.mxu1 %v2720_v0 }
 0xb5e   :  { %2487 = vmatpush3.bf16.msra.mxu0 %v3397_v36  ;;  %2505 = vmatpush3.bf16.msra.mxu1 %v3536_v33 }
 0xb5f   :  { %2488 = vmatprep.subr.bf16.mxu0 %v2720_v0  ;;  %2506 = vmatprep.subr.bf16.mxu1 %v2720_v0 }
 0xb62   :  { %2489 = vmatpush3.bf16.msra.mxu0 %v3406_v38  ;;  %2507 = vmatpush3.bf16.msra.mxu1 %v3545_v37 }
 0xb63   :  { %2514 = vmatprep.subr.bf16.mxu0 %v2720_v0  ;;  %2508 = vmatprep.subr.bf16.mxu1 %v2720_v0 }
 0xb65   :  { %2491 = vmatmul.mubr.bf16.vlgmr.msra.gmra.mrb[48].mxu0 %v1379_v23 }
 0xb66   :  { %2515 = vmatpush3.bf16.msra.mxu0 %v3415_v41  ;;  %2530 = vmatprep.mubr.msk.bf16.mxu0 %vm2721_vm0, %v2720_v0 }
 0xb67   :  { %2516 = vmatprep.subr.bf16.mxu0 %v2720_v0  ;;  %2509 = vmatpush3.bf16.msra.mxu1 %v3554_v39 }
 0xb68   :  { %2534 = vmatprep.subr.bf16.mxu1 %v2720_v0 }
 0xb6a   :  { %2517 = vmatpush3.bf16.msra.mxu0 %v3426_v45 }
 0xb6b   :  { %2518 = vmatprep.subr.bf16.mxu0 %v2720_v0 }
 0xb6e   :  { %2519 = vmatpush3.bf16.msra.mxu0 %v3433_v47 }
 0xb6f   :  { %2520 = vmatprep.subr.bf16.mxu0 %v2720_v0 }
 0xb72   :  { %2521 = vmatpush3.bf16.msra.mxu0 %v3440_v9 }
 0xb73   :  { %2522 = vmatprep.subr.bf16.mxu0 %v2720_v0 }
 0xb76   :  { %2523 = vmatpush3.bf16.msra.mxu0 %v3447_v10  ;;  %v156_v10 = vadd.f32 %v3472_v48, %v3072_v60 }
 0xb77   :  { %2524 = vmatprep.subr.bf16.mxu0 %v2720_v0 }
 0xb7a   :  { %2525 = vmatpush3.bf16.msra.mxu0 %v3454_v11 }
 0xb7b   :  { %2526 = vmatprep.subr.bf16.mxu0 %v2720_v0 }
 0xb7e   :  { %2527 = vmatpush3.bf16.msra.mxu0 %v3461_v12 }
 0xb7f   :  { %2528 = vmatprep.subr.bf16.mxu0 %v2720_v0 }
 0xb82   :  { %2529 = vmatpush3.bf16.msra.mxu0 %v3576_v43 }
 0xc18   :  { %v1414_v27 = vpop.f32.mrb[44].mxu0 }
 0xc19   :  { %v2452_v5 = vpop.f32.mrb[45].mxu0  ;;  %v1415_v31 = vadd.f32 %v3589_v49, %v1414_v27  ;;  %v2593_v27 = vld [vmem:[%s3730_s9 + $0x28] sm:$0xff]  }
 0xc1a   :  { %v1417_v28 = vpop.f32.mrb[46].mxu0 }
 0xc1b   :  { %v2453_v26 = vpop.f32.mrb[47].mxu0  ;;  %v2594_v28 = vld [vmem:[%s3730_s9 + $0x30] sm:$0xff]  }
 0xc1c   :  { %v1455_v29 = vpop.f32.mrb[40].mxu1  ;;  %v2595_v26 = vld [vmem:[%s3730_s9 + $0x38] sm:$0xff]  }
 0xc1d   :  { %v1456_v32 = vadd.f32 %v3583_v42, %v1455_v29  ;;  %v2472_v57 = vpop.f32.mrb[41].mxu1  ;;  %v16_v29 = vstv %s3731_s10 }
 0xc1e   :  { %v1458_v8 = vpop.f32.mrb[42].mxu1  ;;  %17 = vst [vmem:[#allocation3] sm:$0x1] %v16_v29 }
 0xc1f   :  { %v1461_v36 = vadd.f32 %v1456_v32, %v1415_v31  ;;  %v2473_v38 = vpop.f32.mrb[43].mxu1 }
 0xc21   :  { %v1802_v41 = vmul.f32 -1.442695, %v1461_v36 }
 0xc23   :  { %2674 = vpow2.f32 %v1802_v41 }
 0xc2d   :  { %v2675_v45 = vpop.eup %2674 }
 0xc2e   :  { %v1465_v47 = vadd.f32 1.0, %v2675_v45 }
 0xc30   :  { %2676 = vrcp.f32 %v1465_v47 }
 0xc38   :  { %v1513_v9 = vpop.f32.mrb[48].mxu0 }
 0xc39   :  { %v1514_v11 = vadd.f32 %v3479_v35, %v1513_v9  ;;  %v2492_v12 = vpop.f32.mrb[49].mxu0  ;;  %v1805_v9 = vld [vmem:[#allocation3] ss:$0 sm:$0xff] }
 0xc3a   :  { %v2677_v17 = vpop.eup %2676  ;;  %v1516_v20 = vpop.f32.mrb[50].mxu0 }
 0xc3b   :  { %v1519_v18 = vadd.f32 %v1514_v11, %v156_v10  ;;  %v2493_v33 = vpop.f32.mrb[51].mxu0  ;;  %1468 = vrot.lane.b32.xlu0 %v2677_v17, %s2723_s30 }
 0xc3d   :  { %v1803_v37 = vmul.f32 -1.442695, %v1519_v18 }
 0xc3f   :  { %2678 = vpow2.f32 %v1803_v37  ;;  %1473 = vrot.lane.b32.xlu0 %v2677_v17, %s2724_s15 }
 0xc49   :  { %v2679_v39 = vpop.eup %2678 }
 0xc4a   :  { %v1523_v43 = vadd.f32 1.0, %v2679_v39 }
 0xc4c   :  { %2680 = vrcp.f32 %v1523_v43 }
 0xc56   :  { %v2681_v44 = vpop.eup %2680 }
 0xc57   :  { %1526 = vrot.lane.b32.xlu1 %v2681_v44, %s2723_s30 }
 0xc5b   :  { %1531 = vrot.lane.b32.xlu1 %v2681_v44, %s2724_s15 }
 0xcad   :  { %v1469_v60 = vpop.permute.xlu0 %1468 }
 0xcae   :  { %v1470_v48 = vmul.f32 %v1469_v60, %v1456_v32 }
 0xcb0   :  { %v1471_v35 = vadd.f32 %v1470_v48, %v1415_v31 }
 0xcb1   :  { %v1474_v51 = vpop.permute.xlu0 %1473 }
 0xcb2   :  { %2682 = vtanh.f32 %v1471_v35 }
 0xcbc   :  { %v2683_v50 = vpop.eup %2682 }
 0xcbd   :  { %v1475_v61 = vsub.f32 %v3605_v59, %v2683_v50 }
 0xcbf   :  { %v1476_v52 = vmul.f32 %v1475_v61, %v1474_v51 }
 0xcc1   :  { %v3672_v21 = vadd.f32 %v2683_v50, %v1476_v52 }
 0xcc3   :  { %v1577_v55 = vpack.c.bf16 %v3672_v21, %v3672_v21 }
 0xcc5   :  { %2531 = vmatmul.mubr.bf16.vlgmr.msra.gmra.mrb[52].mxu0 %v1577_v55 }
 0xcc9   :  { %v1527_v63 = vpop.permute.xlu1 %1526 }
 0xcca   :  { %v1528_v4 = vmul.f32 %v1527_v63, %v1514_v11 }
 0xccc   :  { %v1529_v62 = vadd.f32 %v1528_v4, %v156_v10 }
 0xccd   :  { %v1532_v2 = vpop.permute.xlu1 %1531 }
 0xcce   :  { %2684 = vtanh.f32 %v1529_v62 }
 0xcd8   :  { %v2685_v22 = vpop.eup %2684 }
 0xcd9   :  { %v1533_v34 = vsub.f32 %v3600_v6, %v2685_v22 }
 0xcdb   :  { %v1534_v3 = vmul.f32 %v1533_v34, %v1532_v2 }
 0xcdd   :  { %v1535_v58 = vadd.f32 %v2685_v22, %v1534_v3 }
 0xcdf   :  { %v1536_v30 = vpack.c.bf16 %v1535_v58, %v1535_v58 }
 0xce1   :  { %2511 = vmatmul.mubr.bf16.vlgmr.msra.gmra.mrb[44].mxu1 %v1536_v30 }
 0xce2   :  { %2550 = vmatprep.mubr.msk.bf16.mxu1 %vm2721_vm0, %v2720_v0  ;;  %2535 = vmatpush3.bf16.msra.mxu1 %v2588_v54 }
 0xce3   :  { %2536 = vmatprep.subr.bf16.mxu1 %v2720_v0 }
 0xce6   :  { %2537 = vmatpush3.bf16.msra.mxu1 %v2589_v14 }
 0xce7   :  { %2538 = vmatprep.subr.bf16.mxu1 %v2720_v0 }
 0xcea   :  { %2539 = vmatpush3.bf16.msra.mxu1 %v2590_v24 }
 0xceb   :  { %2540 = vmatprep.subr.bf16.mxu1 %v2720_v0 }
 0xd98   :  { %v1612_v15 = vpop.f32.mrb[52].mxu0 }
 0xd99   :  { %v2532_v16 = vpop.f32.mrb[53].mxu0  ;;  %v1613_v19 = vadd.f32 %v3583_v42, %v1612_v15  ;;  %v2591_v42 = vld [vmem:[%s3730_s9 + $0x18] sm:$0xff]  }
 0xd9a   :  { %v1615_v1 = vpop.f32.mrb[54].mxu0  ;;  %2541 = vmatpush3.bf16.msra.mxu1 %v2591_v42 }
 0xd9b   :  { %v2533_v46 = vpop.f32.mrb[55].mxu0  ;;  %2542 = vmatprep.subr.bf16.mxu1 %v2720_v0 }
 0xdb4   :  { %v1571_v13 = vpop.f32.mrb[44].mxu1 }
 0xdb5   :  { %v1572_v25 = vadd.f32 %v3589_v49, %v1571_v13  ;;  %v2512_v56 = vpop.f32.mrb[45].mxu1  ;;  %v2592_v49 = vld [vmem:[%s3730_s9 + $0x20] sm:$0xff]  }
 0xdb6   :  { %v1574_v6 = vpop.f32.mrb[46].mxu1  ;;  %2543 = vmatpush3.bf16.msra.mxu1 %v2592_v49 }
 0xdb7   :  { %v1618_v40 = vadd.f32 %v1613_v19, %v1572_v25  ;;  %v2513_v7 = vpop.f32.mrb[47].mxu1  ;;  %2544 = vmatprep.subr.bf16.mxu1 %v2720_v0 }
 0xdb9   :  { %v1804_v23 = vmul.f32 -1.442695, %v1618_v40 }
 0xdba   :  { %2545 = vmatpush3.bf16.msra.mxu1 %v2593_v27 }
 0xdbb   :  { %2686 = vpow2.f32 %v1804_v23  ;;  %2546 = vmatprep.subr.bf16.mxu1 %v2720_v0 }
 0xdbe   :  { %2547 = vmatpush3.bf16.msra.mxu1 %v2594_v28 }
 0xdbf   :  { %2548 = vmatprep.subr.bf16.mxu1 %v2720_v0 }
 0xdc2   :  { %2549 = vmatpush3.bf16.msra.mxu1 %v2595_v26 }
 0xdc5   :  { %v2687_v59 = vpop.eup %2686 }
 0xdc6   :  { %v1622_v53 = vadd.f32 1.0, %v2687_v59 }
 0xdc8   :  { %2688 = vrcp.f32 %v1622_v53 }
 0xdd2   :  { %v2689_v5 = vpop.eup %2688 }
 0xdd3   :  { %1630 = vrot.lane.b32.xlu1 %v2689_v5, %s2724_s15  ;;  %1625 = vrot.lane.b32.xlu0 %v2689_v5, %s2723_s30 }
 0xe45   :  { %v1626_v31 = vpop.permute.xlu0 %1625  ;;  %v1631_v38 = vpop.permute.xlu1 %1630 }
 0xe46   :  { %v1627_v32 = vmul.f32 %v1626_v31, %v1613_v19 }
 0xe48   :  { %v1628_v57 = vadd.f32 %v1627_v32, %v1572_v25 }
 0xe4a   :  { %2690 = vtanh.f32 %v1628_v57 }
 0xe54   :  { %v2691_v8 = vpop.eup %2690 }
 0xe55   :  { %v1632_v36 = vsub.f32 %v3672_v21, %v2691_v8 }
 0xe57   :  { %v1633_v41 = vmul.f32 %v1632_v36, %v1631_v38 }
 0xe59   :  { %v1634_v45 = vadd.f32 %v2691_v8, %v1633_v41 }
 0xe5b   :  { %v1635_v47 = vpack.c.bf16 %v1634_v45, %v1634_v45 }
 0xe5d   :  { %2551 = vmatmul.mubr.bf16.vlgmr.msra.gmra.mrb[48].mxu1 %v1635_v47 }
 0xf30   :  { %v1741_v0 = vpop.f32.mrb[48].mxu1 }
 0xf31   :  { %v1742_v10 = vadd.f32 %v1805_v9, %v1741_v0  ;;  %v2552_v11 = vpop.f32.mrb[49].mxu1 }
 0xf32   :  { %v1744_v12 = vpop.f32.mrb[50].mxu1 }
 0xf33   :  { %1748 = vst.msk [vmem:[%s3732_s11] sm:$0xf] %vm1747_vm3, %v1742_v10  ;;  %v2553_v17 = vpop.f32.mrb[51].mxu1 }

</bundles_post_ra>
